<compile_context>
chip_gen: v6e
topology: v6e:2x2x1
jax: 0.10.0
libtpu: 0.0.40
codegen_flags: <defaults>
</compile_context>

<pallas_src>
import jax
import jax.numpy as jnp
from jax import lax
from jax.experimental import pallas as pl
from jax.experimental.pallas import tpu as pltpu

# ---- module-consistent (small) demo config ---------------------------------
HV = 32                  # vision_config.hidden_size
MERGE = 4                # merge_kernel_size[0] * merge_kernel_size[1] (2 x 2)
HIDDEN = HV * MERGE      # 128  (projector hidden_size)
TEXT_HIDDEN = 128        # text_config.hidden_size
N_TOKENS = 250           # merged tokens (not a multiple of TM -> exercises partial block)
EPS = 1e-5


def _projector_kernel(x_ref, gk_ref, ge_ref, w1_ref, b1_ref, w2_ref, b2_ref, o_ref):
    # x_ref: (TM, HIDDEN) lane-dense block; each row = MERGE groups of HV elements.
    x = x_ref[...].astype(jnp.float32)                 # LN statistics in f32
    gk = gk_ref[...]                                   # (HIDDEN, MERGE): 1/HV per group column

    # Two INDEPENDENT skinny stats matmuls (no mean -> square -> var MXU chain).
    ex = jnp.dot(x, gk, preferred_element_type=jnp.float32)        # (TM, MERGE)  E[x]
    ex2 = jnp.dot(x * x, gk, preferred_element_type=jnp.float32)   # (TM, MERGE)  E[x^2]
    var = jnp.maximum(ex2 - ex * ex, 0.0)              # clamp against cancellation
    inv = lax.rsqrt(var + EPS)                         # (TM, MERGE)

    # Broadcast per-group scale/shift back to all lanes with a tiny expand matmul.
    ge = ge_ref[...]                                   # (MERGE, HIDDEN) 0/1 group-expand
    scale = jnp.dot(inv, ge, preferred_element_type=jnp.float32)        # (TM, HIDDEN)
    shift = jnp.dot(-ex * inv, ge, preferred_element_type=jnp.float32)  # (TM, HIDDEN)
    xn = x * scale + shift                             # normalized (LN affine folded into W1/b1)

    # linear_1 (+ folded LN affine): bf16 MXU operands, f32 accumulation; then QuickGELU.
    h1 = jnp.dot(xn.astype(jnp.bfloat16), w1_ref[...],
                 preferred_element_type=jnp.float32) + b1_ref[...]
    h1 = h1 * jax.nn.sigmoid(1.702 * h1)

    # linear_2: bf16 operands, f32 accumulation.
    out = jnp.dot(h1.astype(jnp.bfloat16), w2_ref[...],
                  preferred_element_type=jnp.float32) + b2_ref[...]
    o_ref[...] = out.astype(o_ref.dtype)


def prepare_projector_params(ln_w, ln_b, w1, b1, w2, b2, *, merge=MERGE, hv=HV):
    """One-time parameter preparation, hoisted out of the forward path.

    w1 / w2 use the torch nn.Linear layout (out_features, in_features).
    """
    hidden = merge * hv
    ln_w_full = jnp.tile(jnp.asarray(ln_w, jnp.float32).reshape(-1), merge)   # (hidden,)
    ln_b_full = jnp.tile(jnp.asarray(ln_b, jnp.float32).reshape(-1), merge)   # (hidden,)

    w1_t = jnp.asarray(w1, jnp.float32).T              # (in, out)
    w2_t = jnp.asarray(w2, jnp.float32).T              # (in, out)

    # Fold the LayerNorm affine into W1 / b1 in f32, *then* cast weights to bf16.
    w1_eff = (w1_t * ln_w_full[:, None]).astype(jnp.bfloat16)                 # (hidden, hidden)
    b1_eff = (ln_b_full @ w1_t
              + jnp.asarray(b1, jnp.float32).reshape(-1)).reshape(1, hidden)  # f32
    w2_bf = w2_t.astype(jnp.bfloat16)
    b2_f = jnp.asarray(b2, jnp.float32).reshape(1, -1)

    # Skinny group-averaging / group-expand matrices (replace the dense block-diag G).
    group_id = jnp.arange(hidden, dtype=jnp.int32) // hv
    gk = (group_id[:, None] == jnp.arange(merge, dtype=jnp.int32)[None, :]
          ).astype(jnp.float32) / hv                                          # (hidden, merge)
    ge = (jnp.arange(merge, dtype=jnp.int32)[:, None] == group_id[None, :]
          ).astype(jnp.float32)                                               # (merge, hidden)

    return dict(w1=w1_eff, b1=b1_eff, w2=w2_bf, b2=b2_f, gk=gk, ge=ge)


def _pick_tm(n_tokens):
    """256 rows on 256-wide-MXU chips (v6e/v7x) when >= 2 blocks exist, else 128."""
    kind = jax.devices()[0].device_kind.lower()
    narrow_mxu = any(tag in kind for tag in ("v2", "v3", "v4", "v5"))  # 128-wide MXU gens
    if (not narrow_mxu) and n_tokens >= 2 * 256:
        return 256
    return 128


def kimi_vl_projector(image_features, params, *, tm=None):
    """image_features: (N, MERGE, HV). Returns (N, TEXT_HIDDEN) in the input dtype."""
    hidden = params["w1"].shape[0]
    text_hidden = params["w2"].shape[1]
    merge = params["gk"].shape[1]

    # Row-major flatten == torch .view(-1, hidden): lane-dense (tm, hidden) blocks.
    x = image_features.reshape(-1, hidden)
    n = x.shape[0]
    if tm is None:
        tm = _pick_tm(n)
    n_blocks = pl.cdiv(n, tm)          # partial last block masked by Pallas (no jnp.pad copy)
    out_dtype = image_features.dtype

    def run(single_buffer_weights):
        def const_spec(shape):
            idx = lambda i: (0,) * len(shape)
            if single_buffer_weights:
                # Grid-invariant operands: one VMEM buffer is enough (no point double-buffering).
                return pl.BlockSpec(shape, idx, pipeline_mode=pl.Buffered(1))
            return pl.BlockSpec(shape, idx)

        return pl.pallas_call(
            _projector_kernel,
            out_shape=jax.ShapeDtypeStruct((n, text_hidden), out_dtype),
            grid_spec=pltpu.PrefetchScalarGridSpec(
                num_scalar_prefetch=0,
                grid=(n_blocks,),
                in_specs=[
                    pl.BlockSpec((tm, hidden), lambda i: (i, 0)),   # x block (lane dense)
                    const_spec((hidden, merge)),                    # group-averaging (f32)
                    const_spec((merge, hidden)),                    # group-expand (f32)
                    const_spec((hidden, hidden)),                   # W1^T, LN-folded (bf16)
                    const_spec((1, hidden)),                        # b1, LN-folded (f32)
                    const_spec((hidden, text_hidden)),              # W2^T (bf16)
                    const_spec((1, text_hidden)),                   # b2 (f32)
                ],
                out_specs=pl.BlockSpec((tm, text_hidden), lambda i: (i, 0)),
            ),
            compiler_params=pltpu.CompilerParams(
                dimension_semantics=("parallel",),
                vmem_limit_bytes=48 * 1024 * 1024),
        )(x, params["gk"], params["ge"], params["w1"], params["b1"],
          params["w2"], params["b2"])

    try:
        return run(single_buffer_weights=True)
    except Exception:
        # pipeline_mode=pl.Buffered(1) unsupported on this jax build -> default buffering.
        return run(single_buffer_weights=False)


def _reference(image_features, ln_w, ln_b, w1, b1, w2, b2):
    """Spec-faithful reference with the same bf16 MXU operand precision as the kernel."""
    x = jnp.asarray(image_features, jnp.float32)
    mean = jnp.mean(x, axis=-1, keepdims=True)
    var = jnp.mean((x - mean) ** 2, axis=-1, keepdims=True)
    xn = (x - mean) * lax.rsqrt(var + EPS) * ln_w.reshape(-1) + ln_b.reshape(-1)
    h = xn.reshape(-1, HIDDEN)
    h1 = jnp.dot(h.astype(jnp.bfloat16), w1.T.astype(jnp.bfloat16),
                 preferred_element_type=jnp.float32) + b1.reshape(1, -1)
    h1 = h1 * jax.nn.sigmoid(1.702 * h1)
    out = jnp.dot(h1.astype(jnp.bfloat16), w2.T.astype(jnp.bfloat16),
                  preferred_element_type=jnp.float32) + b2.reshape(1, -1)
    return out


if __name__ == "__main__":
    key = jax.random.PRNGKey(0)
    k_x, k_lnw, k_lnb, k_w1, k_b1, k_w2, k_b2 = jax.random.split(key, 7)

    # Deterministic synthetic parameters (shapes from the module __init__);
    # activations in bf16 as the surrounding model would run.
    image_features = jax.random.normal(
        k_x, (N_TOKENS, MERGE, HV), jnp.float32).astype(jnp.bfloat16)
    ln_w = 1.0 + 0.1 * jax.random.normal(k_lnw, (HV,), jnp.float32)
    ln_b = 0.1 * jax.random.normal(k_lnb, (HV,), jnp.float32)
    # torch nn.Linear weight layout: (out_features, in_features)
    w1 = 0.05 * jax.random.normal(k_w1, (HIDDEN, HIDDEN), jnp.float32)
    b1 = 0.05 * jax.random.normal(k_b1, (HIDDEN,), jnp.float32)
    w2 = 0.05 * jax.random.normal(k_w2, (TEXT_HIDDEN, HIDDEN), jnp.float32)
    b2 = 0.05 * jax.random.normal(k_b2, (TEXT_HIDDEN,), jnp.float32)

    # One-time parameter prep (outside the forward path).
    params = prepare_projector_params(ln_w, ln_b, w1, b1, w2, b2)

    out = kimi_vl_projector(image_features, params)
    jax.block_until_ready(out)

    ref = _reference(image_features, ln_w, ln_b, w1, b1, w2, b2)
    assert out.shape == (N_TOKENS, TEXT_HIDDEN)
    assert out.dtype == image_features.dtype
    err = jnp.max(jnp.abs(out.astype(jnp.float32) - ref))
    assert jnp.allclose(out.astype(jnp.float32), ref, atol=2e-2, rtol=2e-2), float(err)

    print("KERNEL_OK")
</pallas_src>

<mosaic_0001>
module attributes {stable_mosaic.version = 11 : i64} {
  func.func @_projector_kernel(%arg0: i32, %arg1: memref<128x128xbf16, #tpu.memory_space<vmem>>, %arg2: memref<128x4xf32, #tpu.memory_space<vmem>>, %arg3: memref<4x128xf32, #tpu.memory_space<vmem>>, %arg4: memref<128x128xbf16, #tpu.memory_space<vmem>>, %arg5: memref<1x128xf32, #tpu.memory_space<vmem>>, %arg6: memref<128x128xbf16, #tpu.memory_space<vmem>>, %arg7: memref<1x128xf32, #tpu.memory_space<vmem>>, %arg8: memref<128x128xbf16, #tpu.memory_space<vmem>>) attributes {dimension_semantics = [#tpu.dimension_semantics<parallel>], iteration_bounds = array<i64: 2>, scalar_prefetch = 0 : i64, scratch_operands = 0 : i64, tpu.core_type = #tpu.core_type<tc>, window_params = [{transform_indices = @transform_0, window_bounds = array<i64: 128, 128>}, {pipeline_mode = #tpu.pipeline_mode<synchronous>, transform_indices = @transform_1, window_bounds = array<i64: 128, 4>}, {pipeline_mode = #tpu.pipeline_mode<synchronous>, transform_indices = @transform_2, window_bounds = array<i64: 4, 128>}, {pipeline_mode = #tpu.pipeline_mode<synchronous>, transform_indices = @transform_3, window_bounds = array<i64: 128, 128>}, {pipeline_mode = #tpu.pipeline_mode<synchronous>, transform_indices = @transform_4, window_bounds = array<i64: 1, 128>}, {pipeline_mode = #tpu.pipeline_mode<synchronous>, transform_indices = @transform_5, window_bounds = array<i64: 128, 128>}, {pipeline_mode = #tpu.pipeline_mode<synchronous>, transform_indices = @transform_6, window_bounds = array<i64: 1, 128>}, {transform_indices = @transform_7, window_bounds = array<i64: 128, 128>}]} {
    %c0 = arith.constant 0 : index
    %c0_0 = arith.constant 0 : index
    %0 = vector.load %arg1[%c0, %c0_0] : memref<128x128xbf16, #tpu.memory_space<vmem>>, vector<128x128xbf16>
    %1 = arith.extf %0 : vector<128x128xbf16> to vector<128x128xf32>
    %c0_1 = arith.constant 0 : index
    %c0_2 = arith.constant 0 : index
    %2 = vector.load %arg2[%c0_1, %c0_2] : memref<128x4xf32, #tpu.memory_space<vmem>>, vector<128x4xf32>
    %cst = arith.constant dense<0.000000e+00> : vector<128x4xf32>
    %3 = tpu.matmul %1, %2, %cst {dimension_numbers = #tpu.dot_dimension_numbers<[1], [0], [0], [1], [0, 0, 1, 1], [], []>} : vector<128x128xf32>, vector<128x4xf32>, vector<128x4xf32> -> vector<128x4xf32>
    %4 = arith.mulf %1, %1 : vector<128x128xf32>
    %cst_3 = arith.constant dense<0.000000e+00> : vector<128x4xf32>
    %5 = tpu.matmul %4, %2, %cst_3 {dimension_numbers = #tpu.dot_dimension_numbers<[1], [0], [0], [1], [0, 0, 1, 1], [], []>} : vector<128x128xf32>, vector<128x4xf32>, vector<128x4xf32> -> vector<128x4xf32>
    %6 = arith.mulf %3, %3 : vector<128x4xf32>
    %7 = arith.subf %5, %6 : vector<128x4xf32>
    %cst_4 = arith.constant 0.000000e+00 : f32
    %8 = vector.broadcast %cst_4 : f32 to vector<128x4xf32>
    %9 = arith.maximumf %7, %8 : vector<128x4xf32>
    %cst_5 = arith.constant 9.99999974E-6 : f32
    %10 = vector.broadcast %cst_5 : f32 to vector<128x4xf32>
    %11 = arith.addf %9, %10 : vector<128x4xf32>
    %12 = math.rsqrt %11 : vector<128x4xf32>
    %c0_6 = arith.constant 0 : index
    %c0_7 = arith.constant 0 : index
    %13 = vector.load %arg3[%c0_6, %c0_7] : memref<4x128xf32, #tpu.memory_space<vmem>>, vector<4x128xf32>
    %cst_8 = arith.constant dense<0.000000e+00> : vector<128x128xf32>
    %14 = tpu.matmul %12, %13, %cst_8 {dimension_numbers = #tpu.dot_dimension_numbers<[1], [0], [0], [1], [0, 0, 1, 1], [], []>} : vector<128x4xf32>, vector<4x128xf32>, vector<128x128xf32> -> vector<128x128xf32>
    %cst_9 = arith.constant 0.000000e+00 : f32
    %15 = vector.broadcast %cst_9 : f32 to vector<128x4xf32>
    %16 = arith.subf %15, %3 : vector<128x4xf32>
    %17 = arith.mulf %16, %12 : vector<128x4xf32>
    %cst_10 = arith.constant dense<0.000000e+00> : vector<128x128xf32>
    %18 = tpu.matmul %17, %13, %cst_10 {dimension_numbers = #tpu.dot_dimension_numbers<[1], [0], [0], [1], [0, 0, 1, 1], [], []>} : vector<128x4xf32>, vector<4x128xf32>, vector<128x128xf32> -> vector<128x128xf32>
    %19 = arith.mulf %1, %14 : vector<128x128xf32>
    %20 = arith.addf %19, %18 : vector<128x128xf32>
    %21 = arith.truncf %20 : vector<128x128xf32> to vector<128x128xbf16>
    %c0_11 = arith.constant 0 : index
    %c0_12 = arith.constant 0 : index
    %22 = vector.load %arg4[%c0_11, %c0_12] : memref<128x128xbf16, #tpu.memory_space<vmem>>, vector<128x128xbf16>
    %cst_13 = arith.constant dense<0.000000e+00> : vector<128x128xf32>
    %23 = tpu.matmul %21, %22, %cst_13 {dimension_numbers = #tpu.dot_dimension_numbers<[1], [0], [0], [1], [0, 0, 1, 1], [], []>} : vector<128x128xbf16>, vector<128x128xbf16>, vector<128x128xf32> -> vector<128x128xf32>
    %c0_14 = arith.constant 0 : index
    %c0_15 = arith.constant 0 : index
    %24 = vector.load %arg5[%c0_14, %c0_15] : memref<1x128xf32, #tpu.memory_space<vmem>>, vector<1x128xf32>
    %25 = vector.broadcast %24 : vector<1x128xf32> to vector<128x128xf32>
    %26 = arith.addf %23, %25 : vector<128x128xf32>
    %cst_16 = arith.constant 1.702000e+00 : f32
    %27 = vector.broadcast %cst_16 : f32 to vector<128x128xf32>
    %28 = arith.mulf %27, %26 : vector<128x128xf32>
    %29 = arith.negf %28 : vector<128x128xf32>
    %30 = math.exp %29 : vector<128x128xf32>
    %cst_17 = arith.constant 1.000000e+00 : f32
    %31 = vector.broadcast %cst_17 : f32 to vector<128x128xf32>
    %32 = arith.addf %31, %30 : vector<128x128xf32>
    %33 = arith.divf %31, %32 : vector<128x128xf32>
    %34 = arith.mulf %26, %33 : vector<128x128xf32>
    %35 = arith.truncf %34 : vector<128x128xf32> to vector<128x128xbf16>
    %c0_18 = arith.constant 0 : index
    %c0_19 = arith.constant 0 : index
    %36 = vector.load %arg6[%c0_18, %c0_19] : memref<128x128xbf16, #tpu.memory_space<vmem>>, vector<128x128xbf16>
    %cst_20 = arith.constant dense<0.000000e+00> : vector<128x128xf32>
    %37 = tpu.matmul %35, %36, %cst_20 {dimension_numbers = #tpu.dot_dimension_numbers<[1], [0], [0], [1], [0, 0, 1, 1], [], []>} : vector<128x128xbf16>, vector<128x128xbf16>, vector<128x128xf32> -> vector<128x128xf32>
    %c0_21 = arith.constant 0 : index
    %c0_22 = arith.constant 0 : index
    %38 = vector.load %arg7[%c0_21, %c0_22] : memref<1x128xf32, #tpu.memory_space<vmem>>, vector<1x128xf32>
    %39 = vector.broadcast %38 : vector<1x128xf32> to vector<128x128xf32>
    %40 = arith.addf %37, %39 : vector<128x128xf32>
    %41 = arith.truncf %40 : vector<128x128xf32> to vector<128x128xbf16>
    %c0_23 = arith.constant 0 : index
    %c0_24 = arith.constant 0 : index
    %42 = vector.load %arg8[%c0_23, %c0_24] : memref<128x128xbf16, #tpu.memory_space<vmem>>, vector<128x128xbf16>
    tpu.vector_store %arg8[%c0_23, %c0_24], %41 {strides = array<i32>} : memref<128x128xbf16, #tpu.memory_space<vmem>>, vector<128x128xbf16>,
    return
  }
  func.func @transform_0(%arg0: i32) -> (i32, i32) {
    %c0_i32 = arith.constant 0 : i32
    %c0_i32_0 = arith.constant 0 : i32
    return %arg0, %c0_i32 : i32, i32
  }
  func.func @transform_1(%arg0: i32) -> (i32, i32) {
    %c0_i32 = arith.constant 0 : i32
    %c0_i32_0 = arith.constant 0 : i32
    %c0_i32_1 = arith.constant 0 : i32
    return %c0_i32, %c0_i32_0 : i32, i32
  }
  func.func @transform_2(%arg0: i32) -> (i32, i32) {
    %c0_i32 = arith.constant 0 : i32
    %c0_i32_0 = arith.constant 0 : i32
    %c0_i32_1 = arith.constant 0 : i32
    return %c0_i32, %c0_i32_0 : i32, i32
  }
  func.func @transform_3(%arg0: i32) -> (i32, i32) {
    %c0_i32 = arith.constant 0 : i32
    %c0_i32_0 = arith.constant 0 : i32
    %c0_i32_1 = arith.constant 0 : i32
    return %c0_i32, %c0_i32_0 : i32, i32
  }
  func.func @transform_4(%arg0: i32) -> (i32, i32) {
    %c0_i32 = arith.constant 0 : i32
    %c0_i32_0 = arith.constant 0 : i32
    %c0_i32_1 = arith.constant 0 : i32
    return %c0_i32, %c0_i32_0 : i32, i32
  }
  func.func @transform_5(%arg0: i32) -> (i32, i32) {
    %c0_i32 = arith.constant 0 : i32
    %c0_i32_0 = arith.constant 0 : i32
    %c0_i32_1 = arith.constant 0 : i32
    return %c0_i32, %c0_i32_0 : i32, i32
  }
  func.func @transform_6(%arg0: i32) -> (i32, i32) {
    %c0_i32 = arith.constant 0 : i32
    %c0_i32_0 = arith.constant 0 : i32
    %c0_i32_1 = arith.constant 0 : i32
    return %c0_i32, %c0_i32_0 : i32, i32
  }
  func.func @transform_7(%arg0: i32) -> (i32, i32) {
    %c0_i32 = arith.constant 0 : i32
    %c0_i32_0 = arith.constant 0 : i32
    return %arg0, %c0_i32 : i32, i32
  }
}

module attributes {stable_mosaic.version = 11 : i64} {
  func.func @_projector_kernel(%arg0: i32, %arg1: memref<128x128xbf16, #tpu.memory_space<vmem>>, %arg2: memref<128x4xf32, #tpu.memory_space<vmem>>, %arg3: memref<4x128xf32, #tpu.memory_space<vmem>>, %arg4: memref<128x128xbf16, #tpu.memory_space<vmem>>, %arg5: memref<1x128xf32, #tpu.memory_space<vmem>>, %arg6: memref<128x128xbf16, #tpu.memory_space<vmem>>, %arg7: memref<1x128xf32, #tpu.memory_space<vmem>>, %arg8: memref<128x128xbf16, #tpu.memory_space<vmem>>) attributes {dimension_semantics = [#tpu.dimension_semantics<parallel>], iteration_bounds = array<i64: 2>, scalar_prefetch = 0 : i64, scratch_operands = 0 : i64, tpu.core_type = #tpu.core_type<tc>, window_params = [{transform_indices = @transform_0, window_bounds = array<i64: 128, 128>}, {pipeline_mode = #tpu.pipeline_mode<synchronous>, transform_indices = @transform_1, window_bounds = array<i64: 128, 4>}, {pipeline_mode = #tpu.pipeline_mode<synchronous>, transform_indices = @transform_2, window_bounds = array<i64: 4, 128>}, {pipeline_mode = #tpu.pipeline_mode<synchronous>, transform_indices = @transform_3, window_bounds = array<i64: 128, 128>}, {pipeline_mode = #tpu.pipeline_mode<synchronous>, transform_indices = @transform_4, window_bounds = array<i64: 1, 128>}, {pipeline_mode = #tpu.pipeline_mode<synchronous>, transform_indices = @transform_5, window_bounds = array<i64: 128, 128>}, {pipeline_mode = #tpu.pipeline_mode<synchronous>, transform_indices = @transform_6, window_bounds = array<i64: 1, 128>}, {transform_indices = @transform_7, window_bounds = array<i64: 128, 128>}]} {
    %c0 = arith.constant 0 : index
    %c0_0 = arith.constant 0 : index
    %0 = vector.load %arg1[%c0, %c0_0] : memref<128x128xbf16, #tpu.memory_space<vmem>>, vector<128x128xbf16>
    %1 = arith.extf %0 : vector<128x128xbf16> to vector<128x128xf32>
    %c0_1 = arith.constant 0 : index
    %c0_2 = arith.constant 0 : index
    %2 = vector.load %arg2[%c0_1, %c0_2] : memref<128x4xf32, #tpu.memory_space<vmem>>, vector<128x4xf32>
    %cst = arith.constant dense<0.000000e+00> : vector<128x4xf32>
    %3 = tpu.matmul %1, %2, %cst {dimension_numbers = #tpu.dot_dimension_numbers<[1], [0], [0], [1], [0, 0, 1, 1], [], []>} : vector<128x128xf32>, vector<128x4xf32>, vector<128x4xf32> -> vector<128x4xf32>
    %4 = arith.mulf %1, %1 : vector<128x128xf32>
    %cst_3 = arith.constant dense<0.000000e+00> : vector<128x4xf32>
    %5 = tpu.matmul %4, %2, %cst_3 {dimension_numbers = #tpu.dot_dimension_numbers<[1], [0], [0], [1], [0, 0, 1, 1], [], []>} : vector<128x128xf32>, vector<128x4xf32>, vector<128x4xf32> -> vector<128x4xf32>
    %6 = arith.mulf %3, %3 : vector<128x4xf32>
    %7 = arith.subf %5, %6 : vector<128x4xf32>
    %cst_4 = arith.constant 0.000000e+00 : f32
    %8 = vector.broadcast %cst_4 : f32 to vector<128x4xf32>
    %9 = arith.maximumf %7, %8 : vector<128x4xf32>
    %cst_5 = arith.constant 9.99999974E-6 : f32
    %10 = vector.broadcast %cst_5 : f32 to vector<128x4xf32>
    %11 = arith.addf %9, %10 : vector<128x4xf32>
    %12 = math.rsqrt %11 : vector<128x4xf32>
    %c0_6 = arith.constant 0 : index
    %c0_7 = arith.constant 0 : index
    %13 = vector.load %arg3[%c0_6, %c0_7] : memref<4x128xf32, #tpu.memory_space<vmem>>, vector<4x128xf32>
    %cst_8 = arith.constant dense<0.000000e+00> : vector<128x128xf32>
    %14 = tpu.matmul %12, %13, %cst_8 {dimension_numbers = #tpu.dot_dimension_numbers<[1], [0], [0], [1], [0, 0, 1, 1], [], []>} : vector<128x4xf32>, vector<4x128xf32>, vector<128x128xf32> -> vector<128x128xf32>
    %cst_9 = arith.constant 0.000000e+00 : f32
    %15 = vector.broadcast %cst_9 : f32 to vector<128x4xf32>
    %16 = arith.subf %15, %3 : vector<128x4xf32>
    %17 = arith.mulf %16, %12 : vector<128x4xf32>
    %cst_10 = arith.constant dense<0.000000e+00> : vector<128x128xf32>
    %18 = tpu.matmul %17, %13, %cst_10 {dimension_numbers = #tpu.dot_dimension_numbers<[1], [0], [0], [1], [0, 0, 1, 1], [], []>} : vector<128x4xf32>, vector<4x128xf32>, vector<128x128xf32> -> vector<128x128xf32>
    %19 = arith.mulf %1, %14 : vector<128x128xf32>
    %20 = arith.addf %19, %18 : vector<128x128xf32>
    %21 = arith.truncf %20 : vector<128x128xf32> to vector<128x128xbf16>
    %c0_11 = arith.constant 0 : index
    %c0_12 = arith.constant 0 : index
    %22 = vector.load %arg4[%c0_11, %c0_12] : memref<128x128xbf16, #tpu.memory_space<vmem>>, vector<128x128xbf16>
    %cst_13 = arith.constant dense<0.000000e+00> : vector<128x128xf32>
    %23 = tpu.matmul %21, %22, %cst_13 {dimension_numbers = #tpu.dot_dimension_numbers<[1], [0], [0], [1], [0, 0, 1, 1], [], []>} : vector<128x128xbf16>, vector<128x128xbf16>, vector<128x128xf32> -> vector<128x128xf32>
    %c0_14 = arith.constant 0 : index
    %c0_15 = arith.constant 0 : index
    %24 = vector.load %arg5[%c0_14, %c0_15] : memref<1x128xf32, #tpu.memory_space<vmem>>, vector<1x128xf32>
    %25 = vector.broadcast %24 : vector<1x128xf32> to vector<128x128xf32>
    %26 = arith.addf %23, %25 : vector<128x128xf32>
    %cst_16 = arith.constant 1.702000e+00 : f32
    %27 = vector.broadcast %cst_16 : f32 to vector<128x128xf32>
    %28 = arith.mulf %27, %26 : vector<128x128xf32>
    %29 = arith.negf %28 : vector<128x128xf32>
    %30 = math.exp %29 : vector<128x128xf32>
    %cst_17 = arith.constant 1.000000e+00 : f32
    %31 = vector.broadcast %cst_17 : f32 to vector<128x128xf32>
    %32 = arith.addf %31, %30 : vector<128x128xf32>
    %33 = arith.divf %31, %32 : vector<128x128xf32>
    %34 = arith.mulf %26, %33 : vector<128x128xf32>
    %35 = arith.truncf %34 : vector<128x128xf32> to vector<128x128xbf16>
    %c0_18 = arith.constant 0 : index
    %c0_19 = arith.constant 0 : index
    %36 = vector.load %arg6[%c0_18, %c0_19] : memref<128x128xbf16, #tpu.memory_space<vmem>>, vector<128x128xbf16>
    %cst_20 = arith.constant dense<0.000000e+00> : vector<128x128xf32>
    %37 = tpu.matmul %35, %36, %cst_20 {dimension_numbers = #tpu.dot_dimension_numbers<[1], [0], [0], [1], [0, 0, 1, 1], [], []>} : vector<128x128xbf16>, vector<128x128xbf16>, vector<128x128xf32> -> vector<128x128xf32>
    %c0_21 = arith.constant 0 : index
    %c0_22 = arith.constant 0 : index
    %38 = vector.load %arg7[%c0_21, %c0_22] : memref<1x128xf32, #tpu.memory_space<vmem>>, vector<1x128xf32>
    %39 = vector.broadcast %38 : vector<1x128xf32> to vector<128x128xf32>
    %40 = arith.addf %37, %39 : vector<128x128xf32>
    %41 = arith.truncf %40 : vector<128x128xf32> to vector<128x128xbf16>
    %c0_23 = arith.constant 0 : index
    %c0_24 = arith.constant 0 : index
    %42 = vector.load %arg8[%c0_23, %c0_24] : memref<128x128xbf16, #tpu.memory_space<vmem>>, vector<128x128xbf16>
    tpu.vector_store %arg8[%c0_23, %c0_24], %41 {strides = array<i32>} : memref<128x128xbf16, #tpu.memory_space<vmem>>, vector<128x128xbf16>,
    return
  }
  func.func @transform_0(%arg0: i32) -> (i32, i32) {
    %c0_i32 = arith.constant 0 : i32
    %c0_i32_0 = arith.constant 0 : i32
    return %arg0, %c0_i32 : i32, i32
  }
  func.func @transform_1(%arg0: i32) -> (i32, i32) {
    %c0_i32 = arith.constant 0 : i32
    %c0_i32_0 = arith.constant 0 : i32
    %c0_i32_1 = arith.constant 0 : i32
    return %c0_i32, %c0_i32_0 : i32, i32
  }
  func.func @transform_2(%arg0: i32) -> (i32, i32) {
    %c0_i32 = arith.constant 0 : i32
    %c0_i32_0 = arith.constant 0 : i32
    %c0_i32_1 = arith.constant 0 : i32
    return %c0_i32, %c0_i32_0 : i32, i32
  }
  func.func @transform_3(%arg0: i32) -> (i32, i32) {
    %c0_i32 = arith.constant 0 : i32
    %c0_i32_0 = arith.constant 0 : i32
    %c0_i32_1 = arith.constant 0 : i32
    return %c0_i32, %c0_i32_0 : i32, i32
  }
  func.func @transform_4(%arg0: i32) -> (i32, i32) {
    %c0_i32 = arith.constant 0 : i32
    %c0_i32_0 = arith.constant 0 : i32
    %c0_i32_1 = arith.constant 0 : i32
    return %c0_i32, %c0_i32_0 : i32, i32
  }
  func.func @transform_5(%arg0: i32) -> (i32, i32) {
    %c0_i32 = arith.constant 0 : i32
    %c0_i32_0 = arith.constant 0 : i32
    %c0_i32_1 = arith.constant 0 : i32
    return %c0_i32, %c0_i32_0 : i32, i32
  }
  func.func @transform_6(%arg0: i32) -> (i32, i32) {
    %c0_i32 = arith.constant 0 : i32
    %c0_i32_0 = arith.constant 0 : i32
    %c0_i32_1 = arith.constant 0 : i32
    return %c0_i32, %c0_i32_0 : i32, i32
  }
  func.func @transform_7(%arg0: i32) -> (i32, i32) {
    %c0_i32 = arith.constant 0 : i32
    %c0_i32_0 = arith.constant 0 : i32
    return %arg0, %c0_i32 : i32, i32
  }
}

</mosaic_0001>

<bundles_post_ra>
// kernel: tpu_custom_call.1
= control target key start
LH: loop header
LB: loop body
LE: loop exit
PB: predicated region body
PF: predicated region fallthrough
CT: control target
= control target key end

     0   :  { %12 = vsyncpa [#allocation3], 0  ;;  %s3286_s0 = inlined_call_operand.vmem [shape: bf16[250,128], index: 0, kind: input, shape index: {}]   ;;  %s3287_s1 = inlined_call_operand.vmem [shape: f32[128,4], index: 1, kind: input, shape index: {}]   ;;  %s3288_s2 = inlined_call_operand.vmem [shape: f32[4,128], index: 2, kind: input, shape index: {}]   ;;  %s3289_s3 = inlined_call_operand.hbm [shape: bf16[128,128], index: 3, kind: input, shape index: {}]   ;;  %s3290_s4 = inlined_call_operand.vmem [shape: f32[1,128], index: 4, kind: input, shape index: {}]   ;;  %s3291_s5 = inlined_call_operand.hbm [shape: bf16[128,128], index: 5, kind: input, shape index: {}]   ;;  %s3292_s6 = inlined_call_operand.vmem [shape: f32[1,128], index: 6, kind: input, shape index: {}]   ;;  %s3293_s7 = inlined_call_operand.hbm [shape: bf16[250,128], index: 7, kind: output, shape index: {}]  }
   0x1   :  { %13 = vsyncpa [#allocation6], 0 }
   0x2   :  { %14 = vsyncpa [#allocation4], 0 }
   0x3   :  { %16 = vsyncpa [#allocation4 + $0x1], 0  ;;  %s2765_s24 = smov 0   ;;  %s2767_s25 = smov 0  }
   0x4   :  { %s2769_s26 = smov 0   ;;  %s2771_s27 = smov 0  }
   0x5 LB: > { %s2786_s28 = sadd.s32 4294967295, %s2716_s27   ;;  %s1859_s29 = sadd.s32 4294967294, %s2716_s27   ;;  %s2716_s27 = sphi %s2771_s27, %s3307_s27   ;;  %s2712_s26 = sphi %s2769_s26, %s3306_s26   ;;  %s2708_s25 = sphi %s2767_s25, %s3305_s25   ;;  %s2704_s24 = sphi %s2765_s24, %s3304_s24  }
   0x6   : > { %s2790_s30 = sadd.s32 1, %s2716_s27   ;;  %s181_s8 = sadd.s32 1, %s2712_s26 }
   0x7   : > { %s178_s9 = ssub.s32 %s2716_s27, %s2790_s30  ;;  %p191_p0 = scmp.ne.s32.totalorder %s2712_s26, %s2708_s25 }
   0x8   : > { %p179_p1 = scmp.eq.s32.totalorder %s178_s9, 0  ;;  %p192_p2 = scmp.eq.s32.totalorder %s2786_s28, 1 }
   0x9   : > { %p197_p3 = scmp.ne.s32.totalorder %s2708_s25, %s2704_s24  ;;  %p198_p4 = scmp.eq.s32.totalorder %s1859_s29, 1 }
   0xa   : > { %s2801_s10 = scalar_select %p179_p1, %s2712_s26, %s181_s8  }
   0xb   : > { %p2803_p5 = por %p192_p2, %p191_p0  ;;  %p2807_p6 = por %p198_p4, %p197_p3 }
   0xc   : > { %p1860_p7 = scmp.ge.s32.totalorder %s2716_s27, 1  ;;  %p205_p8 = scmp.lt.s32.totalorder %s2716_s27, 3 }
   0xd   : > { %s3296_s12 = scalar_select %p2807_p6, 1, 0 }
   0xe   : > { %p3294_p9 = scmp.eq.s32.totalorder %s2786_s28, 0  ;;  %p2814_p10 = pnand %p1860_p7, %p205_p8 }
   0xf   : > { %s2718_s14 = smov [#allocation2]   ;;  %s2719_s17 = smov [#allocation5]  }
  0x10   : > { %s223_s15 = sshll.u32 %s2718_s14, 4  ;;  %p2430_p11 = pneg %p2814_p10  ;;  %s224_s15 = int_to_ptr.vmem [resolvable:$true] %s223_s15 }
  0x11   : > { %s239_s18 = sshll.u32 %s2719_s17, 4  ;;  %s2607_s19 = scalar_lea.vmem %s224_s15, 1024  ;;  %s240_s18 = int_to_ptr.vmem [resolvable:$true] %s239_s18 }
  0x12   : > { %p2822_p12 = pnand %p3294_p9, %p2430_p11  ;;  %p2608_p0 = scmp.ne.s32.totalorder %s224_s15, %s2607_s19 }
  0x13   : > { %p2615_p3 = scmp.lt.s32.totalorder %s224_s15, %s224_s15  ;;  %p2616_p4 = scmp.lt.s32.totalorder %s2607_s19, %s2607_s19 }
  0x14   : > { %p2598_p13 = pneg %p2822_p12 }
  0x15   : > { %p2617_p7 = por %p2616_p4, %p2615_p3 }
  0x16   : > { %p2610_p1 = pnand %p2608_p0, %p2598_p13 }
  0x18   : > { %p2611_p2 = pneg %p2610_p1 }
  0x1a   : > { %p2618_p8 = pnand %p2617_p7, %p2611_p2 }
  0x1c   : > { %2621 = shalt.err (!%p2618_p8)
}
  0x1d   : > { %s2720_s20 = smov 64   ;;  %s2721_s21 = smov 4  }
  0x1e   : > { %2433 = dma.hbm_to_vmem [thread:$0]  (!%p2822_p12), %s3289_s3, 1024, %s224_s15, [#allocation3], %s2720_s20, %s2720_s20, %s2721_s21  }
  0x1f   : > { %s2633_s29 = scalar_lea.vmem %s240_s18, 1024  ;;  %p2641_p9 = scmp.lt.s32.totalorder %s240_s18, %s240_s18 }
  0x20   : > { %p2634_p11 = scmp.ne.s32.totalorder %s240_s18, %s2633_s29  ;;  %p2642_p6 = scmp.lt.s32.totalorder %s2633_s29, %s2633_s29 }
  0x22   : > { %p2636_p0 = pnand %p2634_p11, %p2598_p13  ;;  %p2643_p3 = por %p2642_p6, %p2641_p9 }
  0x24   : > { %p2637_p1 = pneg %p2636_p0 }
  0x26   : > { %p2644_p2 = pnand %p2643_p3, %p2637_p1 }
  0x28   : > { %2647 = shalt.err (!%p2644_p2)
}
  0x29   : > { %2436 = dma.hbm_to_vmem [thread:$0]  (!%p2822_p12), %s3291_s5, 1024, %s240_s18, [#allocation6], %s2720_s20, %s2720_s20, %s2721_s21  }
  0x2a   : > { %267 = sbr.rel (%p2814_p10) target bundleno = 991 (0x3df), region = 48  ;;  %p3299_p4 = scmp.eq.s32.totalorder (!%p2814_p10), %s2786_s28, 0 }
  0x2f   : > { %2691 = dma.done.wait (%p3299_p4), [#allocation3], 1024   ;;  %p3300_p13 = pmov %p3299_p4 }
  0x30   : > { %p3301_p7 = pmov %p3299_p4 }
  0x31   : > { %2693 = vsyncadd (%p3300_p13), [#allocation3], 4294966272 }
  0x32   : > { %2695 = dma.done.wait (%p3301_p7), [#allocation6], 1024   ;;  %p3302_p6 = pmov %p3299_p4 }
  0x33   : > { %s1868_s14 = sshll.u32 %s2786_s28, 4  ;;  %v358_v0 = vld [vmem:[%s3287_s1 + $0x78] sm:$0xff]  ;;  %v357_v1 = vld [vmem:[%s3287_s1 + $0x70] sm:$0xff]  ;;  %v356_v2 = vld [vmem:[%s3287_s1 + $0x68] sm:$0xff]  ;;  %vm795_vm0 = vcmask 1043456   ;;  %vm746_vm1 = vcmask 31744  }
  0x34   : > { %2697 = vsyncadd (%p3302_p6), [#allocation6], 4294966272  ;;  %p304_p9 = scmp.lt.s32.totalorder %s1868_s14, 31  ;;  %2192 = vmatprep.subr.mxu0 %v358_v0  ;;  %2248 = vmatprep.subr.mxu1 %v358_v0  ;;  %v355_v3 = vld [vmem:[%s3287_s1 + $0x60] sm:$0xff]  ;;  %v354_v4 = vld [vmem:[%s3287_s1 + $0x58] sm:$0xff]  ;;  %s300_s9 = sand.u32 1, %s2708_s25  }
  0x35   : > { %2193 = vmatpush3.msra.mxu0 %v358_v0  ;;  %2249 = vmatpush3.msra.mxu1 %v358_v0  ;;  %v353_v5 = vld [vmem:[%s3287_s1 + $0x50] sm:$0xff]  ;;  %v352_v6 = vld [vmem:[%s3287_s1 + $0x48] sm:$0xff]  ;;  %v351_v7 = vld [vmem:[%s3287_s1 + $0x40] sm:$0xff]  ;;  %s1867_s17 = sshll.u32 %s300_s9, 6  ;;  %s1975_s19 = sshll.u32 %s2786_s28, 10 }
  0x36   : > { %2194 = vmatprep.subr.mxu0 %v357_v1  ;;  %2250 = vmatprep.subr.mxu1 %v357_v1  ;;  %s3309_s14 = smov (!%p304_p9, %s1868_s14), 31  ;;  %v350_v8 = vld [vmem:[%s3287_s1 + $0x38] sm:$0xff]  ;;  %v349_v9 = vld [vmem:[%s3287_s1 + $0x30] sm:$0xff]  ;;  %v348_v10 = vld [vmem:[%s3287_s1 + $0x28] sm:$0xff]  ;;  %s3240_s21 = scalar_lea.hbm %s3293_s7, %s1975_s19 }
  0x37   : > { %2195 = vmatpush3.msra.mxu0 %v357_v1  ;;  %2251 = vmatpush3.msra.mxu1 %v357_v1  ;;  %s1869_s16 = sshll.u32 %s3309_s14, 2  ;;  %v347_v11 = vld [vmem:[%s3287_s1 + $0x20] sm:$0xff]  ;;  %v346_v12 = vld [vmem:[%s3287_s1 + $0x18] sm:$0xff]  ;;  %v345_v14 = vld [vmem:[%s3287_s1 + $0x10] sm:$0xff]  ;;  %s3246_s22 = scalar_lea.sflag [#allocation4], %s300_s9 }
  0x38   : > { %2196 = vmatprep.subr.mxu0 %v356_v2  ;;  %2252 = vmatprep.subr.mxu1 %v356_v2  ;;  %s2894_s8 = scalar_lea.vmem %s3286_s0, %s1869_s16  ;;  %v344_v17 = vld [vmem:[%s3287_s1 + $0x8] sm:$0xff]  ;;  %v343_v20 = vld [vmem:[%s3287_s1] sm:$0xff]  ;;  %v3002_v57 = vld [vmem:[#allocation2 + $0x38] sm:$0xff]   ;;  %s3225_s16 = scalar_lea.vmem [#allocation7], %s1867_s17 }
  0x39   : > { %2197 = vmatpush3.msra.mxu0 %v356_v2  ;;  %2253 = vmatpush3.msra.mxu1 %v356_v2  ;;  %v1977_v13 = vld [vmem:[%s2894_s8] sm:$0xff]   ;;  %v2048_v15 = vld [vmem:[%s2894_s8 + $0x8] sm:$0xff]   ;;  %v2049_v21 = vld [vmem:[%s2894_s8 + $0x10] sm:$0xff]   ;;  %s1775_s18 = sshll.u32 %s3225_s16, 4  ;;  %s2722_s23 = smov [#allocation7]   ;;  %s3235_s18 = int_to_ptr.vmem [resolvable:$true] %s1775_s18 }
  0x3a   : > { %2198 = vmatprep.subr.mxu0 %v355_v3  ;;  %2254 = vmatprep.subr.mxu1 %v355_v3  ;;  %v2907_v16 = vunpack.c.l.bf16 %v1977_v13  ;;  %v2912_v18 = vunpack.c.h.bf16 %v1977_v13  ;;  %v2914_v19 = vunpack.c.l.bf16 %v2048_v15  ;;  %v2924_v24 = vunpack.c.h.bf16 %v2048_v15  ;;  %v2050_v27 = vld [vmem:[%s2894_s8 + $0x18] sm:$0xff]   ;;  %v745_v28 = vld [vmem:[%s3288_s2] sm:$0xf]  ;;  %v2052_v38 = vld [vmem:[%s2894_s8 + $0x28] sm:$0xff]   ;;  %s2648_s28 = scalar_lea.vmem %s3235_s18, 1024  ;;  %s2652_s29 = sshll.u32 %s2722_s23, 4  ;;  %s2653_s29 = int_to_ptr.vmem [resolvable:$false] %s2652_s29 }
  0x3b   : > { %2199 = vmatpush3.msra.mxu0 %v355_v3  ;;  %2255 = vmatpush3.msra.mxu1 %v355_v3  ;;  %v2928_v26 = vunpack.c.l.bf16 %v2049_v21  ;;  %v2938_v30 = vunpack.c.h.bf16 %v2049_v21  ;;  %v2943_v32 = vunpack.c.l.bf16 %v2050_v27  ;;  %v2051_v33 = vld [vmem:[%s2894_s8 + $0x20] sm:$0xff]   ;;  %v2949_v35 = vunpack.c.h.bf16 %v2050_v27  ;;  %v2053_v43 = vld [vmem:[%s2894_s8 + $0x30] sm:$0xff]   ;;  %v2054_v48 = vld [vmem:[%s2894_s8 + $0x38] sm:$0xff]   ;;  %p2649_p10 = scmp.ne.s32.totalorder %s3235_s18, %s2648_s28  ;;  %s2654_s8 = scalar_lea.vmem %s2653_s29, 2048 }
  0x3c   : > { %2200 = vmatprep.subr.mxu0 %v354_v4  ;;  %2256 = vmatprep.subr.mxu1 %v354_v4  ;;  %v504_v22 = vmul.f32 %v2907_v16, %v2907_v16  ;;  %v505_v23 = vmul.f32 %v2912_v18, %v2912_v18  ;;  %v506_v25 = vmul.f32 %v2914_v19, %v2914_v19  ;;  %v2954_v37 = vunpack.c.l.bf16 %v2051_v33  ;;  %p2655_p11 = scmp.lt.s32.totalorder %s3235_s18, %s2653_s29  ;;  %p2656_p0 = scmp.lt.s32.totalorder %s2654_s8, %s2648_s28 }
  0x3d   : > { %2201 = vmatpush3.msra.mxu0 %v354_v4  ;;  %2257 = vmatpush3.msra.mxu1 %v354_v4  ;;  %v507_v29 = vmul.f32 %v2924_v24, %v2924_v24  ;;  %v508_v31 = vmul.f32 %v2928_v26, %v2928_v26  ;;  %v509_v34 = vmul.f32 %v2938_v30, %v2938_v30  ;;  %v2960_v40 = vunpack.c.h.bf16 %v2051_v33  ;;  %p2650_p12 = pnand %p2649_p10, %p2803_p5 }
  0x3e   : > { %2202 = vmatprep.subr.mxu0 %v353_v5  ;;  %2258 = vmatprep.subr.mxu1 %v353_v5  ;;  %v510_v36 = vmul.f32 %v2943_v32, %v2943_v32  ;;  %v511_v39 = vmul.f32 %v2949_v35, %v2949_v35  ;;  %v512_v41 = vmul.f32 %v2954_v37, %v2954_v37  ;;  %v2965_v42 = vunpack.c.l.bf16 %v2052_v38  ;;  %p2657_p1 = por %p2656_p0, %p2655_p11 }
  0x3f   : > { %2203 = vmatpush3.msra.mxu0 %v353_v5  ;;  %2259 = vmatpush3.msra.mxu1 %v353_v5  ;;  %v513_v44 = vmul.f32 %v2960_v40, %v2960_v40  ;;  %v2971_v45 = vunpack.c.h.bf16 %v2052_v38  ;;  %v2976_v47 = vunpack.c.l.bf16 %v2053_v43  ;;  %v2982_v50 = vunpack.c.h.bf16 %v2053_v43  ;;  %p2651_p8 = pneg %p2650_p12 }
  0x40   : > { %2204 = vmatprep.subr.mxu0 %v352_v6  ;;  %2260 = vmatprep.subr.mxu1 %v352_v6  ;;  %v514_v46 = vmul.f32 %v2965_v42, %v2965_v42  ;;  %v2987_v52 = vunpack.c.l.bf16 %v2054_v48  ;;  %v2992_v54 = vunpack.c.h.bf16 %v2054_v48 }
  0x41   : > { %2205 = vmatpush3.msra.mxu0 %v352_v6  ;;  %2261 = vmatpush3.msra.mxu1 %v352_v6  ;;  %v515_v49 = vmul.f32 %v2971_v45, %v2971_v45  ;;  %v516_v51 = vmul.f32 %v2976_v47, %v2976_v47  ;;  %v517_v53 = vmul.f32 %v2982_v50, %v2982_v50  ;;  %p2658_p3 = pnand %p2657_p1, %p2651_p8 }
  0x42   : > { %2206 = vmatprep.subr.mxu0 %v351_v7  ;;  %2262 = vmatprep.subr.mxu1 %v351_v7  ;;  %v518_v55 = vmul.f32 %v2987_v52, %v2987_v52  ;;  %v519_v56 = vmul.f32 %v2992_v54, %v2992_v54 }
  0x43   : > { %2207 = vmatpush3.msra.mxu0 %v351_v7  ;;  %2263 = vmatpush3.msra.mxu1 %v351_v7 }
  0x44   : > { %2208 = vmatprep.subr.mxu0 %v350_v8  ;;  %2264 = vmatprep.subr.mxu1 %v350_v8 }
  0x45   : > { %2209 = vmatpush3.msra.mxu0 %v350_v8  ;;  %2265 = vmatpush3.msra.mxu1 %v350_v8 }
  0x46   : > { %2210 = vmatprep.subr.mxu0 %v349_v9  ;;  %2266 = vmatprep.subr.mxu1 %v349_v9 }
  0x47   : > { %2211 = vmatpush3.msra.mxu0 %v349_v9  ;;  %2267 = vmatpush3.msra.mxu1 %v349_v9 }
  0x48   : > { %2212 = vmatprep.subr.mxu0 %v348_v10  ;;  %2268 = vmatprep.subr.mxu1 %v348_v10 }
  0x49   : > { %2213 = vmatpush3.msra.mxu0 %v348_v10  ;;  %2269 = vmatpush3.msra.mxu1 %v348_v10 }
  0x4a   : > { %2214 = vmatprep.subr.mxu0 %v347_v11  ;;  %2270 = vmatprep.subr.mxu1 %v347_v11 }
  0x4b   : > { %2215 = vmatpush3.msra.mxu0 %v347_v11  ;;  %2271 = vmatpush3.msra.mxu1 %v347_v11 }
  0x4c   : > { %2216 = vmatprep.subr.mxu0 %v346_v12  ;;  %2272 = vmatprep.subr.mxu1 %v346_v12 }
  0x4d   : > { %2217 = vmatpush3.msra.mxu0 %v346_v12  ;;  %2273 = vmatpush3.msra.mxu1 %v346_v12 }
  0x4e   : > { %2218 = vmatprep.subr.mxu0 %v345_v14  ;;  %2274 = vmatprep.subr.mxu1 %v345_v14 }
  0x4f   : > { %2219 = vmatpush3.msra.mxu0 %v345_v14  ;;  %2275 = vmatpush3.msra.mxu1 %v345_v14 }
  0x50   : > { %2220 = vmatprep.subr.mxu0 %v344_v17  ;;  %2276 = vmatprep.subr.mxu1 %v344_v17 }
  0x51   : > { %2221 = vmatpush3.msra.mxu0 %v344_v17  ;;  %2277 = vmatpush3.msra.mxu1 %v344_v17 }
  0x52   : > { %2222 = vmatprep.subr.mxu0 %v343_v20  ;;  %2278 = vmatprep.subr.mxu1 %v343_v20 }
  0x53   : > { %2223 = vmatpush3.msra.mxu0 %v343_v20  ;;  %2224 = vmatprep.mubr.f32.mxu0 %v2907_v16 }
  0x54   : > { %2279 = vmatpush3.msra.mxu1 %v343_v20  ;;  %2280 = vmatprep.mubr.f32.mxu1 %v504_v22 }
  0x55   : > { %2225 = vmatmul.mubr.f32.vlgmr.msra.gmra.mxu0 %v2912_v18  ;;  %2281 = vmatmul.mubr.f32.vlgmr.msra.gmra.mxu1 %v505_v23 }
  0x56   : > { %2227 = vmatprep.mubr.f32.mxu0 %v2914_v19  ;;  %2283 = vmatprep.mubr.f32.mxu1 %v506_v25 }
  0x57   : > { %2304 = vmatprep.subr.msk.mxu0 %vm795_vm0, %v745_v28  ;;  %2330 = vmatprep.subr.msk.mxu1 %vm795_vm0, %v745_v28 }
  0x58   : > { %2305 = vmatpush3.msk.msra.mxu0 %vm795_vm0, %v745_v28  ;;  %2331 = vmatpush3.msk.msra.mxu1 %vm795_vm0, %v745_v28 }
  0x59   : > { %2228 = vmatmul.mubr.f32.gmra.mxu0 %v2924_v24  ;;  %2284 = vmatmul.mubr.f32.gmra.mxu1 %v507_v29 }
  0x5a   : > { %2230 = vmatprep.mubr.f32.mxu0 %v2928_v26  ;;  %2286 = vmatprep.mubr.f32.mxu1 %v508_v31 }
  0x5b   : > { %2356 = vmatprep.subr.bf16.mxu0 %v3002_v57 }
  0x5d   : > { %2231 = vmatmul.mubr.f32.gmra.mxu0 %v2938_v30  ;;  %2287 = vmatmul.mubr.f32.gmra.mxu1 %v509_v34 }
  0x5e   : > { %2233 = vmatprep.mubr.f32.mxu0 %v2943_v32  ;;  %2289 = vmatprep.mubr.f32.mxu1 %v510_v36 }
  0x61   : > { %2234 = vmatmul.mubr.f32.gmra.mxu0 %v2949_v35  ;;  %2290 = vmatmul.mubr.f32.gmra.mxu1 %v511_v39 }
  0x62   : > { %2236 = vmatprep.mubr.f32.mxu0 %v2954_v37  ;;  %2292 = vmatprep.mubr.f32.mxu1 %v512_v41 }
  0x65   : > { %2237 = vmatmul.mubr.f32.gmra.mxu0 %v2960_v40  ;;  %2293 = vmatmul.mubr.f32.gmra.mxu1 %v513_v44 }
  0x66   : > { %2239 = vmatprep.mubr.f32.mxu0 %v2965_v42  ;;  %2295 = vmatprep.mubr.f32.mxu1 %v514_v46 }
  0x69   : > { %2240 = vmatmul.mubr.f32.gmra.mxu0 %v2971_v45  ;;  %2296 = vmatmul.mubr.f32.gmra.mxu1 %v515_v49 }
  0x6a   : > { %2242 = vmatprep.mubr.f32.mxu0 %v2976_v47  ;;  %2298 = vmatprep.mubr.f32.mxu1 %v516_v51 }
  0x6d   : > { %2243 = vmatmul.mubr.f32.gmra.mxu0 %v2982_v50  ;;  %2299 = vmatmul.mubr.f32.gmra.mxu1 %v517_v53 }
  0x6e   : > { %2245 = vmatprep.mubr.f32.mxu0 %v2987_v52  ;;  %2301 = vmatprep.mubr.f32.mxu1 %v518_v55 }
  0x71   : > { %2246 = vmatmul.mubr.f32.gmra.mxu0 %v2992_v54  ;;  %2302 = vmatmul.mubr.f32.gmra.mxu1 %v519_v56 }
 0x115   : > { %v3005_v58 = vpop.f32.mrf.mxu0  ;;  %v2282_v59 = vpop.f32.mrf.mxu1 }
 0x116   : > { %v666_v60 = vmul.f32 %v3005_v58, %v3005_v58 }
 0x117   : > { %v3009_v61 = vpop.f32.mrf.mxu0  ;;  %v586_v62 = vpop.f32.mrf.mxu1 }
 0x118   : > { %v682_v63 = vsub.f32 %v2282_v59, %v666_v60  ;;  %v665_v0 = vmul.f32 %v3009_v61, %v3009_v61 }
 0x119   : > { %v3013_v1 = vpop.f32.mrf.mxu0  ;;  %v2285_v2 = vpop.f32.mrf.mxu1 }
 0x11a   : > { %v698_v3 = vmax.f32 %v682_v63, 0.0  ;;  %v681_v4 = vsub.f32 %v586_v62, %v665_v0  ;;  %v668_v5 = vmul.f32 %v3013_v1, %v3013_v1 }
 0x11b   : > { %v3017_v6 = vpop.f32.mrf.mxu0  ;;  %v596_v7 = vpop.f32.mrf.mxu1 }
 0x11c   : > { %v714_v8 = vadd.f32 1e-05, %v698_v3  ;;  %v697_v9 = vmax.f32 %v681_v4, 0.0  ;;  %v684_v10 = vsub.f32 %v2285_v2, %v668_v5  ;;  %v667_v11 = vmul.f32 %v3017_v6, %v3017_v6 }
 0x11d   : > { %v3021_v12 = vpop.f32.mrf.mxu0  ;;  %v2288_v13 = vpop.f32.mrf.mxu1 }
 0x11e   : > { %v713_v14 = vadd.f32 1e-05, %v697_v9  ;;  %v700_v15 = vmax.f32 %v684_v10, 0.0  ;;  %v683_v17 = vsub.f32 %v596_v7, %v667_v11  ;;  %2500 = vrsqrt.f32 %v714_v8 }
 0x11f   : > { %v670_v20 = vmul.f32 %v3021_v12, %v3021_v12  ;;  %v3025_v21 = vpop.f32.mrf.mxu0  ;;  %v606_v22 = vpop.f32.mrf.mxu1 }
 0x120   : > { %2502 = vrsqrt.f32 %v713_v14  ;;  %v716_v23 = vadd.f32 1e-05, %v700_v15  ;;  %v699_v25 = vmax.f32 %v683_v17, 0.0  ;;  %v669_v27 = vmul.f32 %v3025_v21, %v3025_v21 }
 0x121   : > { %v686_v28 = vsub.f32 %v2288_v13, %v670_v20  ;;  %v3029_v29 = vpop.f32.mrf.mxu0  ;;  %v2291_v31 = vpop.f32.mrf.mxu1 }
 0x122   : > { %v715_v33 = vadd.f32 1e-05, %v699_v25  ;;  %v685_v34 = vsub.f32 %v606_v22, %v669_v27  ;;  %v672_v36 = vmul.f32 %v3029_v29, %v3029_v29  ;;  %2504 = vrsqrt.f32 %v716_v23 }
 0x123   : > { %v702_v38 = vmax.f32 %v686_v28, 0.0  ;;  %v3033_v39 = vpop.f32.mrf.mxu0  ;;  %v616_v41 = vpop.f32.mrf.mxu1  ;;  %v945_v22 = vsub.f32 0.0, %v3005_v58  ;;  %v944_v23 = vsub.f32 0.0, %v3009_v61 }
 0x124   : > { %2506 = vrsqrt.f32 %v715_v33  ;;  %v701_v43 = vmax.f32 %v685_v34, 0.0  ;;  %v688_v44 = vsub.f32 %v2291_v31, %v672_v36  ;;  %v671_v46 = vmul.f32 %v3033_v39, %v3033_v39  ;;  %v2485_v33 = vld [vmem:[#allocation2 + $0x30] sm:$0xff]  }
 0x125   : > { %v718_v48 = vadd.f32 1e-05, %v702_v38  ;;  %v3037_v49 = vpop.f32.mrf.mxu0  ;;  %v2294_v51 = vpop.f32.mrf.mxu1 }
 0x126   : > { %v717_v53 = vadd.f32 1e-05, %v701_v43  ;;  %v704_v55 = vmax.f32 %v688_v44, 0.0  ;;  %v687_v56 = vsub.f32 %v616_v41, %v671_v46  ;;  %v674_v59 = vmul.f32 %v3037_v49, %v3037_v49 }
 0x127   : > { %2508 = vrsqrt.f32 %v718_v48  ;;  %v3041_v60 = vpop.f32.mrf.mxu0  ;;  %v626_v62 = vpop.f32.mrf.mxu1 }
 0x128   : > { %2510 = vrsqrt.f32 %v717_v53  ;;  %v720_v63 = vadd.f32 1e-05, %v704_v55  ;;  %v703_v0 = vmax.f32 %v687_v56, 0.0  ;;  %v690_v2 = vsub.f32 %v2294_v51, %v674_v59 }
 0x129   : > { %v673_v3 = vmul.f32 %v3041_v60, %v3041_v60  ;;  %v3045_v4 = vpop.f32.mrf.mxu0  ;;  %v2297_v5 = vpop.f32.mrf.mxu1  ;;  %v947_v56 = vsub.f32 0.0, %v3013_v1  ;;  %v946_v59 = vsub.f32 0.0, %v3017_v6 }
 0x12a   : > { %v719_v7 = vadd.f32 1e-05, %v703_v0  ;;  %v706_v8 = vmax.f32 %v690_v2, 0.0  ;;  %v676_v9 = vmul.f32 %v3045_v4, %v3045_v4  ;;  %2512 = vrsqrt.f32 %v720_v63  ;;  %v2486_v2 = vld [vmem:[#allocation2 + $0x28] sm:$0xff]  }
 0x12b   : > { %v689_v10 = vsub.f32 %v626_v62, %v673_v3  ;;  %v3049_v11 = vpop.f32.mrf.mxu0  ;;  %v636_v13 = vpop.f32.mrf.mxu1 }
 0x12c   : > { %v2501_v14 = vpop.eup %2500  ;;  %2514 = vrsqrt.f32 %v719_v7  ;;  %v722_v15 = vadd.f32 1e-05, %v706_v8  ;;  %v692_v17 = vsub.f32 %v2297_v5, %v676_v9  ;;  %v675_v27 = vmul.f32 %v3049_v11, %v3049_v11 }
 0x12d   : > { %v2503_v20 = vpop.eup %2502  ;;  %v705_v25 = vmax.f32 %v689_v10, 0.0  ;;  %v3055_v28 = vpop.f32.mrf.mxu0  ;;  %v961_v38 = vmul.f32 %v2501_v14, %v945_v22 }
 0x12e   : > { %v2300_v31 = vpop.f32.mrf.mxu1  ;;  %v708_v34 = vmax.f32 %v692_v17, 0.0  ;;  %v678_v36 = vmul.f32 %v3055_v28, %v3055_v28  ;;  %2306 = vmatprep.mubr.msk.f32.mxu0 %vm746_vm1, %v2503_v20  ;;  %v691_v43 = vsub.f32 %v636_v13, %v675_v27  ;;  %v960_v44 = vmul.f32 %v2503_v20, %v944_v23  ;;  %v2487_v23 = vld [vmem:[#allocation2 + $0x20] sm:$0xff]  }
 0x12f   : > { %v721_v41 = vadd.f32 1e-05, %v705_v25  ;;  %v3060_v58 = vpop.f32.mrf.mxu0  ;;  %2307 = vmatmul.mubr.msk.f32.vlgmr.msra.gmra.mxu0 %vm746_vm1, %v2501_v14  ;;  %v2505_v46 = vpop.eup %2504  ;;  %2516 = vrsqrt.f32 %v722_v15  ;;  %v948_v20 = vsub.f32 0.0, %v3025_v21  ;;  %v949_v25 = vsub.f32 0.0, %v3021_v12 }
 0x130   : > { %v646_v61 = vpop.f32.mrf.mxu1  ;;  %v724_v48 = vadd.f32 1e-05, %v708_v34  ;;  %v694_v51 = vsub.f32 %v2300_v31, %v678_v36  ;;  %v677_v53 = vmul.f32 %v3060_v58, %v3060_v58  ;;  %2357 = vmatpush3.bf16.msra.mxu0 %v3002_v57  ;;  %v707_v62 = vmax.f32 %v691_v43, 0.0  ;;  %2332 = vmatprep.mubr.msk.f32.mxu1 %vm746_vm1, %v960_v44 }
 0x131   : > { %v2507_v55 = vpop.eup %2506  ;;  %2518 = vrsqrt.f32 %v721_v41  ;;  %v3069_v63 = vpop.f32.mrf.mxu0  ;;  %2358 = vmatprep.subr.bf16.mxu0 %v2485_v33  ;;  %2333 = vmatmul.mubr.msk.f32.vlgmr.msra.gmra.mxu1 %vm746_vm1, %v961_v38  ;;  %v963_v8 = vmul.f32 %v2505_v46, %v947_v56  ;;  %v951_v44 = vsub.f32 0.0, %v3029_v29  ;;  %v953_v29 = vsub.f32 0.0, %v3037_v49 }
 0x132   : > { %v2303_v0 = vpop.f32.mrf.mxu1  ;;  %v710_v3 = vmax.f32 %v694_v51, 0.0  ;;  %v693_v5 = vsub.f32 %v646_v61, %v677_v53  ;;  %v680_v7 = vmul.f32 %v3069_v63, %v3069_v63  ;;  %2309 = vmatprep.mubr.msk.f32.mxu0 %vm746_vm1, %v2507_v55  ;;  %2520 = vrsqrt.f32 %v724_v48  ;;  %v2488_v61 = vld [vmem:[#allocation2 + $0x18] sm:$0xff]  }
 0x133   : > { %v723_v57 = vadd.f32 1e-05, %v707_v62  ;;  %v3075_v1 = vpop.f32.mrf.mxu0  ;;  %2310 = vmatmul.mubr.msk.f32.gmra.mxu0 %vm746_vm1, %v2505_v46  ;;  %v962_v6 = vmul.f32 %v2507_v55, %v946_v59  ;;  %v952_v53 = vsub.f32 0.0, %v3041_v60  ;;  %v955_v60 = vsub.f32 0.0, %v3045_v4 }
 0x134   : > { %v2509_v9 = vpop.eup %2508  ;;  %v726_v10 = vadd.f32 1e-05, %v710_v3  ;;  %v709_v13 = vmax.f32 %v693_v5, 0.0  ;;  %v696_v14 = vsub.f32 %v2303_v0, %v680_v7  ;;  %v679_v15 = vmul.f32 %v3075_v1, %v3075_v1  ;;  %2359 = vmatpush3.bf16.msra.mxu0 %v2485_v33  ;;  %v656_v22 = vpop.f32.mrf.mxu1 }
 0x135   : > { %v2511_v17 = vpop.eup %2510  ;;  %2522 = vrsqrt.f32 %v723_v57  ;;  %2335 = vmatprep.mubr.msk.f32.mxu1 %vm746_vm1, %v962_v6  ;;  %2360 = vmatprep.subr.bf16.mxu0 %v2486_v2  ;;  %v950_v33 = vsub.f32 0.0, %v3033_v39  ;;  %v965_v43 = vmul.f32 %v2509_v9, %v949_v25  ;;  %v954_v0 = vsub.f32 0.0, %v3049_v11 }
 0x136   : > { %v725_v27 = vadd.f32 1e-05, %v709_v13  ;;  %v712_v31 = vmax.f32 %v696_v14, 0.0  ;;  %v695_v34 = vsub.f32 %v656_v22, %v679_v15  ;;  %2336 = vmatmul.mubr.msk.f32.gmra.mxu1 %vm746_vm1, %v963_v8  ;;  %2312 = vmatprep.mubr.msk.f32.mxu0 %vm746_vm1, %v2511_v17  ;;  %2524 = vrsqrt.f32 %v726_v10  ;;  %v2490_v14 = vld [vmem:[#allocation2 + $0x8] sm:$0xff]   ;;  %v2491_v15 = vld [vmem:[#allocation2] sm:$0xff]  }
 0x137   : > { %2313 = vmatmul.mubr.msk.f32.gmra.mxu0 %vm746_vm1, %v2509_v9  ;;  %v964_v21 = vmul.f32 %v2511_v17, %v948_v20  ;;  %v2513_v36 = vpop.eup %2512  ;;  %v956_v5 = vsub.f32 0.0, %v3060_v58  ;;  %v957_v11 = vsub.f32 0.0, %v3055_v28  ;;  %v958_v8 = vsub.f32 0.0, %v3075_v1  ;;  %v2489_v1 = vld [vmem:[#allocation2 + $0x10] sm:$0xff]  }
 0x138   : > { %2526 = vrsqrt.f32 %v725_v27  ;;  %v728_v38 = vadd.f32 1e-05, %v712_v31  ;;  %v711_v41 = vmax.f32 %v695_v34, 0.0  ;;  %2361 = vmatpush3.bf16.msra.mxu0 %v2486_v2  ;;  %v967_v48 = vmul.f32 %v2513_v36, %v951_v44 }
 0x139   : > { %v2515_v12 = vpop.eup %2514  ;;  %2338 = vmatprep.mubr.msk.f32.mxu1 %vm746_vm1, %v964_v21  ;;  %2362 = vmatprep.subr.bf16.mxu0 %v2487_v23  ;;  %v959_v10 = vsub.f32 0.0, %v3069_v63 }
 0x13a   : > { %v727_v46 = vadd.f32 1e-05, %v711_v41  ;;  %2339 = vmatmul.mubr.msk.f32.gmra.mxu1 %vm746_vm1, %v965_v43  ;;  %2315 = vmatprep.mubr.msk.f32.mxu0 %vm746_vm1, %v2515_v12  ;;  %v966_v39 = vmul.f32 %v2515_v12, %v950_v33  ;;  %2528 = vrsqrt.f32 %v728_v38 }
 0x13b   : > { %2316 = vmatmul.mubr.msk.f32.gmra.mxu0 %vm746_vm1, %v2513_v36 }
 0x13c   : > { %2530 = vrsqrt.f32 %v727_v46  ;;  %2341 = vmatprep.mubr.msk.f32.mxu1 %vm746_vm1, %v966_v39  ;;  %2363 = vmatpush3.bf16.msra.mxu0 %v2487_v23  ;;  %v2517_v51 = vpop.eup %2516 }
 0x13d   : > { %2364 = vmatprep.subr.bf16.mxu0 %v2488_v61  ;;  %v969_v62 = vmul.f32 %v2517_v51, %v953_v29 }
 0x13e   : > { %v2519_v55 = vpop.eup %2518  ;;  %2342 = vmatmul.mubr.msk.f32.gmra.mxu1 %vm746_vm1, %v967_v48 }
 0x13f   : > { %2318 = vmatprep.mubr.msk.f32.mxu0 %vm746_vm1, %v2519_v55  ;;  %v968_v56 = vmul.f32 %v2519_v55, %v952_v53  ;;  %v2521_v59 = vpop.eup %2520 }
 0x140   : > { %2319 = vmatmul.mubr.msk.f32.gmra.mxu0 %vm746_vm1, %v2517_v51  ;;  %v971_v7 = vmul.f32 %v2521_v59, %v955_v60 }
 0x141   : > { %2344 = vmatprep.mubr.msk.f32.mxu1 %vm746_vm1, %v968_v56  ;;  %2365 = vmatpush3.bf16.msra.mxu0 %v2488_v61 }
 0x142   : > { %v2523_v2 = vpop.eup %2522  ;;  %2345 = vmatmul.mubr.msk.f32.gmra.mxu1 %vm746_vm1, %v969_v62  ;;  %2366 = vmatprep.subr.bf16.mxu0 %v2489_v1 }
 0x143   : > { %2321 = vmatprep.mubr.msk.f32.mxu0 %vm746_vm1, %v2523_v2  ;;  %v970_v49 = vmul.f32 %v2523_v2, %v954_v0  ;;  %v2525_v3 = vpop.eup %2524 }
 0x144   : > { %2322 = vmatmul.mubr.msk.f32.gmra.mxu0 %vm746_vm1, %v2521_v59  ;;  %v973_v58 = vmul.f32 %v2525_v3, %v957_v11 }
 0x145   : > { %v2527_v57 = vpop.eup %2526  ;;  %2347 = vmatprep.mubr.msk.f32.mxu1 %vm746_vm1, %v970_v49  ;;  %2367 = vmatpush3.bf16.msra.mxu0 %v2489_v1 }
 0x146   : > { %2348 = vmatmul.mubr.msk.f32.gmra.mxu1 %vm746_vm1, %v971_v7  ;;  %2324 = vmatprep.mubr.msk.f32.mxu0 %vm746_vm1, %v2527_v57  ;;  %v972_v4 = vmul.f32 %v2527_v57, %v956_v5 }
 0x147   : > { %v2529_v6 = vpop.eup %2528  ;;  %2368 = vmatprep.subr.bf16.mxu0 %v2490_v14 }
 0x148   : > { %2325 = vmatmul.mubr.msk.f32.gmra.mxu0 %vm746_vm1, %v2525_v3  ;;  %2350 = vmatprep.mubr.msk.f32.mxu1 %vm746_vm1, %v972_v4  ;;  %v975_v13 = vmul.f32 %v2529_v6, %v959_v10 }
 0x149   : > { %v2531_v9 = vpop.eup %2530  ;;  %2369 = vmatpush3.bf16.msra.mxu0 %v2490_v14 }
 0x14a   : > { %2351 = vmatmul.mubr.msk.f32.gmra.mxu1 %vm746_vm1, %v973_v58  ;;  %2327 = vmatprep.mubr.msk.f32.mxu0 %vm746_vm1, %v2531_v9  ;;  %v974_v28 = vmul.f32 %v2531_v9, %v958_v8 }
 0x14b   : > { %2370 = vmatprep.subr.bf16.mxu0 %v2491_v15 }
 0x14c   : > { %2328 = vmatmul.mubr.msk.f32.gmra.mxu0 %vm746_vm1, %v2529_v6  ;;  %2353 = vmatprep.mubr.msk.f32.mxu1 %vm746_vm1, %v974_v28 }
 0x14d   : > { %2371 = vmatpush3.bf16.msra.mxu0 %v2491_v15 }
 0x14e   : > { %2354 = vmatmul.mubr.msk.f32.gmra.mxu1 %vm746_vm1, %v975_v13 }
 0x1ef   : > { %v2308_v63 = vpop.f32.mrf.mxu0 }
 0x1f0   : > { %v1170_v17 = vmul.f32 %v2308_v63, %v2912_v18 }
 0x1f1   : > { %v865_v20 = vpop.f32.mrf.mxu0  ;;  %v2334_v23 = vpop.f32.mrf.mxu1 }
 0x1f2   : > { %v1169_v22 = vmul.f32 %v2907_v16, %v865_v20  ;;  %v1186_v31 = vadd.f32 %v2334_v23, %v1170_v17 }
 0x1f3   : > { %v2311_v25 = vpop.f32.mrf.mxu0  ;;  %v1090_v27 = vpop.f32.mrf.mxu1 }
 0x1f4   : > { %v1172_v34 = vmul.f32 %v2311_v25, %v2924_v24  ;;  %v1185_v33 = vadd.f32 %v1169_v22, %v1090_v27 }
 0x1f5   : > { %v875_v21 = vpop.f32.mrf.mxu0 }
 0x1f6   : > { %v1171_v36 = vmul.f32 %v2914_v19, %v875_v21  ;;  %v2337_v38 = vpop.f32.mrf.mxu1  ;;  %v1201_v41 = vpack.c.bf16 %v1186_v31, %v1185_v33 }
 0x1f7   : > { %v2314_v43 = vpop.f32.mrf.mxu0  ;;  %v1188_v61 = vadd.f32 %v2337_v38, %v1172_v34  ;;  %v2495_v38 = vld [vmem:[#allocation5 + $0x20] sm:$0xff]  }
 0x1f8   : > { %v1100_v12 = vpop.f32.mrf.mxu1  ;;  %v1174_v18 = vmul.f32 %v2314_v43, %v2938_v30  ;;  %2372 = vmatprep.mubr.bf16.mxu0 %v1201_v41  ;;  %v2496_v41 = vld [vmem:[#allocation5 + $0x18] sm:$0xff]   ;;  %v2498_v43 = vld [vmem:[#allocation5 + $0x8] sm:$0xff]  }
 0x1f9   : > { %v1187_v44 = vadd.f32 %v1171_v36, %v1100_v12  ;;  %v885_v16 = vpop.f32.mrf.mxu0  ;;  %v2492_v36 = vld [vmem:[#allocation5 + $0x38] sm:$0xff]   ;;  %v2499_v12 = vld [vmem:[#allocation5] sm:$0xff]  }
 0x1fa   : > { %v1173_v46 = vmul.f32 %v2928_v26, %v885_v16  ;;  %v2340_v39 = vpop.f32.mrf.mxu1  ;;  %2388 = vmatprep.subr.bf16.mxu1 %v2492_v36 }
 0x1fb   : > { %v1202_v48 = vpack.c.bf16 %v1188_v61, %v1187_v44  ;;  %v2317_v51 = vpop.f32.mrf.mxu0  ;;  %v1190_v53 = vadd.f32 %v2340_v39, %v1174_v18  ;;  %2389 = vmatpush3.bf16.msra.mxu1 %v2492_v36  ;;  %v3137_v61 = vld [vmem:[%s3290_s4] ss:$0 sm:$0xff] }
 0x1fc   : > { %v1110_v24 = vpop.f32.mrf.mxu1  ;;  %v1176_v55 = vmul.f32 %v2317_v51, %v2949_v35 }
 0x1fd   : > { %v1189_v19 = vadd.f32 %v1173_v46, %v1110_v24  ;;  %2373 = vmatmul.mubr.bf16.vlgmr.msra.gmra.mxu0 %v1202_v48  ;;  %v895_v29 = vpop.f32.mrf.mxu0 }
 0x1fe   : > { %v1175_v56 = vmul.f32 %v2943_v32, %v895_v29  ;;  %v2343_v59 = vpop.f32.mrf.mxu1 }
 0x1ff   : > { %v1203_v62 = vpack.c.bf16 %v1190_v53, %v1189_v19  ;;  %v1192_v2 = vadd.f32 %v2343_v59, %v1176_v55 }
 0x200   : > { %v2320_v30 = vpop.f32.mrf.mxu0  ;;  %v1120_v0 = vpop.f32.mrf.mxu1 }
 0x201   : > { %v1178_v60 = vmul.f32 %v2320_v30, %v2960_v40  ;;  %v1191_v26 = vadd.f32 %v1175_v56, %v1120_v0  ;;  %2376 = vmatprep.mubr.bf16.mxu0 %v1203_v62 }
 0x202   : > { %v905_v49 = vpop.f32.mrf.mxu0  ;;  %v2346_v3 = vpop.f32.mrf.mxu1 }
 0x203   : > { %v1204_v5 = vpack.c.bf16 %v1192_v2, %v1191_v26  ;;  %v1177_v7 = vmul.f32 %v2954_v37, %v905_v49  ;;  %v1194_v11 = vadd.f32 %v2346_v3, %v1178_v60 }
 0x204   : > { %v2323_v35 = vpop.f32.mrf.mxu0  ;;  %v1130_v57 = vpop.f32.mrf.mxu1 }
 0x205   : > { %v1180_v4 = vmul.f32 %v2323_v35, %v2971_v45  ;;  %v1193_v32 = vadd.f32 %v1177_v7, %v1130_v57  ;;  %2377 = vmatmul.mubr.bf16.gmra.mxu0 %v1204_v5 }
 0x206   : > { %v915_v6 = vpop.f32.mrf.mxu0  ;;  %v2349_v8 = vpop.f32.mrf.mxu1 }
 0x207   : > { %v1205_v58 = vpack.c.bf16 %v1194_v11, %v1193_v32  ;;  %v1179_v9 = vmul.f32 %v2965_v42, %v915_v6  ;;  %v1196_v28 = vadd.f32 %v2349_v8, %v1180_v4 }
 0x208   : > { %v2326_v40 = vpop.f32.mrf.mxu0  ;;  %v1140_v10 = vpop.f32.mrf.mxu1 }
 0x209   : > { %v1182_v13 = vmul.f32 %v2326_v40, %v2982_v50  ;;  %v1195_v1 = vadd.f32 %v1179_v9, %v1140_v10  ;;  %2380 = vmatprep.mubr.bf16.mxu0 %v1205_v58 }
 0x20a   : > { %v925_v37 = vpop.f32.mrf.mxu0  ;;  %v2352_v14 = vpop.f32.mrf.mxu1 }
 0x20b   : > { %v1206_v15 = vpack.c.bf16 %v1196_v28, %v1195_v1  ;;  %v1181_v63 = vmul.f32 %v2976_v47, %v925_v37  ;;  %v1198_v20 = vadd.f32 %v2352_v14, %v1182_v13  ;;  %v2493_v47 = vld [vmem:[#allocation5 + $0x30] sm:$0xff]  }
 0x20c   : > { %v2329_v45 = vpop.f32.mrf.mxu0  ;;  %v1150_v17 = vpop.f32.mrf.mxu1  ;;  %2390 = vmatprep.subr.bf16.mxu1 %v2493_v47 }
 0x20d   : > { %v1184_v22 = vmul.f32 %v2329_v45, %v2992_v54  ;;  %v1197_v23 = vadd.f32 %v1181_v63, %v1150_v17  ;;  %2381 = vmatmul.mubr.bf16.gmra.mxu0 %v1206_v15  ;;  %2391 = vmatpush3.bf16.msra.mxu1 %v2493_v47  ;;  %v2494_v54 = vld [vmem:[#allocation5 + $0x28] sm:$0xff]  }
 0x20e   : > { %v935_v42 = vpop.f32.mrf.mxu0  ;;  %v2355_v25 = vpop.f32.mrf.mxu1  ;;  %2392 = vmatprep.subr.bf16.mxu1 %v2494_v54 }
 0x20f   : > { %v1207_v27 = vpack.c.bf16 %v1198_v20, %v1197_v23  ;;  %v1183_v31 = vmul.f32 %v2987_v52, %v935_v42  ;;  %v1200_v34 = vadd.f32 %v2355_v25, %v1184_v22  ;;  %v2497_v52 = vld [vmem:[#allocation5 + $0x10] sm:$0xff]  }
 0x210   : > { %v1160_v50 = vpop.f32.mrf.mxu1 }
 0x211   : > { %v1199_v33 = vadd.f32 %v1183_v31, %v1160_v50  ;;  %2384 = vmatprep.mubr.bf16.mxu0 %v1207_v27  ;;  %2393 = vmatpush3.bf16.msra.mxu1 %v2494_v54 }
 0x212   : > { %2394 = vmatprep.subr.bf16.mxu1 %v2495_v38 }
 0x213   : > { %v1208_v21 = vpack.c.bf16 %v1200_v34, %v1199_v33 }
 0x215   : > { %2385 = vmatmul.mubr.bf16.gmra.mxu0 %v1208_v21  ;;  %2395 = vmatpush3.bf16.msra.mxu1 %v2495_v38 }
 0x216   : > { %2396 = vmatprep.subr.bf16.mxu1 %v2496_v41 }
 0x219   : > { %2397 = vmatpush3.bf16.msra.mxu1 %v2496_v41 }
 0x21a   : > { %2398 = vmatprep.subr.bf16.mxu1 %v2497_v52 }
 0x21d   : > { %2399 = vmatpush3.bf16.msra.mxu1 %v2497_v52 }
 0x21e   : > { %2400 = vmatprep.subr.bf16.mxu1 %v2498_v43 }
 0x221   : > { %2401 = vmatpush3.bf16.msra.mxu1 %v2498_v43 }
 0x222   : > { %2402 = vmatprep.subr.bf16.mxu1 %v2499_v12 }
 0x225   : > { %2403 = vmatpush3.bf16.msra.mxu1 %v2499_v12 }
 0x2bd   : > { %v2374_v18 = vpop.f32.mrf.mxu0 }
 0x2be   : > { %v3140_v44 = vadd.f32 %v2374_v18, %v3137_v61 }
 0x2bf   : > { %v1314_v16 = vpop.f32.mrf.mxu0 }
 0x2c0   : > { %v1915_v46 = vmul.f32 -1.702, %v3140_v44  ;;  %v3144_v39 = vadd.f32 %v3137_v61, %v1314_v16 }
 0x2c1   : > { %v2375_v48 = vpop.f32.mrf.mxu0 }
 0x2c2   : > { %v1413_v51 = vmul.f32 1.442695, %v1915_v46  ;;  %v1913_v24 = vmul.f32 -1.702, %v3144_v39  ;;  %v3148_v53 = vadd.f32 %v2375_v48, %v3137_v61 }
 0x2c3   : > { %v1317_v55 = vpop.f32.mrf.mxu0 }
 0x2c4   : > { %2532 = vpow2.f32 %v1413_v51  ;;  %v1409_v19 = vmul.f32 1.442695, %v1913_v24  ;;  %v1916_v29 = vmul.f32 -1.702, %v3148_v53  ;;  %v3152_v56 = vadd.f32 %v3137_v61, %v1317_v55 }
 0x2c5   : > { %v2378_v59 = vpop.f32.mrf.mxu0 }
 0x2c6   : > { %2534 = vpow2.f32 %v1409_v19  ;;  %v1415_v62 = vmul.f32 1.442695, %v1916_v29  ;;  %v1914_v30 = vmul.f32 -1.702, %v3152_v56  ;;  %v3156_v0 = vadd.f32 %v2378_v59, %v3137_v61 }
 0x2c7   : > { %v1330_v2 = vpop.f32.mrf.mxu0 }
 0x2c8   : > { %2536 = vpow2.f32 %v1415_v62  ;;  %v1411_v60 = vmul.f32 1.442695, %v1914_v30  ;;  %v1919_v26 = vmul.f32 -1.702, %v3156_v0  ;;  %v3160_v49 = vadd.f32 %v3137_v61, %v1330_v2 }
 0x2c9   : > { %v2379_v3 = vpop.f32.mrf.mxu0 }
 0x2ca   : > { %2538 = vpow2.f32 %v1411_v60  ;;  %v1421_v5 = vmul.f32 1.442695, %v1919_v26  ;;  %v1917_v7 = vmul.f32 -1.702, %v3160_v49  ;;  %v3164_v35 = vadd.f32 %v2379_v3, %v3137_v61 }
 0x2cb   : > { %v1333_v57 = vpop.f32.mrf.mxu0 }
 0x2cc   : > { %2540 = vpow2.f32 %v1421_v5  ;;  %v1417_v11 = vmul.f32 1.442695, %v1917_v7  ;;  %v1920_v4 = vmul.f32 -1.702, %v3164_v35  ;;  %v3168_v32 = vadd.f32 %v3137_v61, %v1333_v57 }
 0x2cd   : > { %v2382_v6 = vpop.f32.mrf.mxu0 }
 0x2ce   : > { %2542 = vpow2.f32 %v1417_v11  ;;  %v1423_v8 = vmul.f32 1.442695, %v1920_v4  ;;  %v1918_v58 = vmul.f32 -1.702, %v3168_v32  ;;  %v3172_v9 = vadd.f32 %v2382_v6, %v3137_v61 }
 0x2cf   : > { %v1346_v40 = vpop.f32.mrf.mxu0 }
 0x2d0   : > { %2544 = vpow2.f32 %v1423_v8  ;;  %v1419_v10 = vmul.f32 1.442695, %v1918_v58  ;;  %v1923_v28 = vmul.f32 -1.702, %v3172_v9  ;;  %v3176_v13 = vadd.f32 %v3137_v61, %v1346_v40 }
 0x2d1   : > { %v2533_v1 = vpop.eup %2532  ;;  %v2383_v37 = vpop.f32.mrf.mxu0 }
 0x2d2   : > { %v1443_v14 = vadd.f32 1.0, %v2533_v1  ;;  %2546 = vpow2.f32 %v1419_v10  ;;  %v1429_v15 = vmul.f32 1.442695, %v1923_v28  ;;  %v1921_v63 = vmul.f32 -1.702, %v3176_v13 }
 0x2d3   : > { %v2535_v45 = vpop.eup %2534  ;;  %v3180_v17 = vadd.f32 %v2383_v37, %v3137_v61  ;;  %v1349_v20 = vpop.f32.mrf.mxu0 }
 0x2d4   : > { %2548 = vrcp.f32 %v1443_v14  ;;  %v1441_v22 = vadd.f32 1.0, %v2535_v45  ;;  %v1425_v23 = vmul.f32 1.442695, %v1921_v63  ;;  %v3183_v42 = vadd.f32 %v3137_v61, %v1349_v20 }
 0x2d5   : > { %v2537_v25 = vpop.eup %2536  ;;  %2550 = vpow2.f32 %v1429_v15  ;;  %v1924_v27 = vmul.f32 -1.702, %v3180_v17  ;;  %v2386_v31 = vpop.f32.mrf.mxu0 }
 0x2d6   : > { %2552 = vrcp.f32 %v1441_v22  ;;  %v1444_v50 = vadd.f32 1.0, %v2537_v25  ;;  %v1922_v34 = vmul.f32 -1.702, %v3183_v42  ;;  %v3188_v33 = vadd.f32 %v2386_v31, %v3137_v61 }
 0x2d7   : > { %v2539_v21 = vpop.eup %2538  ;;  %2554 = vpow2.f32 %v1425_v23  ;;  %v1431_v36 = vmul.f32 1.442695, %v1924_v27  ;;  %v1362_v47 = vpop.f32.mrf.mxu0 }
 0x2d8   : > { %2556 = vrcp.f32 %v1444_v50  ;;  %v1442_v54 = vadd.f32 1.0, %v2539_v21  ;;  %v1427_v38 = vmul.f32 1.442695, %v1922_v34  ;;  %v1927_v41 = vmul.f32 -1.702, %v3188_v33 }
 0x2d9   : > { %v2541_v52 = vpop.eup %2540  ;;  %2558 = vpow2.f32 %v1431_v36  ;;  %v3192_v43 = vadd.f32 %v3137_v61, %v1362_v47  ;;  %v2387_v12 = vpop.f32.mrf.mxu0 }
 0x2da   : > { %2560 = vrcp.f32 %v1442_v54  ;;  %v1447_v18 = vadd.f32 1.0, %v2541_v52  ;;  %v1437_v16 = vmul.f32 1.442695, %v1927_v41  ;;  %v3195_v46 = vadd.f32 %v2387_v12, %v3137_v61 }
 0x2db   : > { %v2543_v48 = vpop.eup %2542  ;;  %2562 = vpow2.f32 %v1427_v38  ;;  %v1925_v51 = vmul.f32 -1.702, %v3192_v43  ;;  %v1365_v24 = vpop.f32.mrf.mxu0 }
 0x2dc   : > { %2564 = vrcp.f32 %v1447_v18  ;;  %v1445_v55 = vadd.f32 1.0, %v2543_v48  ;;  %v1928_v19 = vmul.f32 -1.702, %v3195_v46  ;;  %v3200_v29 = vadd.f32 %v3137_v61, %v1365_v24 }
 0x2dd   : > { %v2545_v59 = vpop.eup %2544  ;;  %2566 = vpow2.f32 %v1437_v16  ;;  %v1433_v62 = vmul.f32 1.442695, %v1925_v51 }
 0x2de   : > { %2568 = vrcp.f32 %v1445_v55  ;;  %v1448_v30 = vadd.f32 1.0, %v2545_v59  ;;  %v1439_v2 = vmul.f32 1.442695, %v1928_v19  ;;  %v1926_v60 = vmul.f32 -1.702, %v3200_v29 }
 0x2df   : > { %v2547_v26 = vpop.eup %2546  ;;  %2570 = vpow2.f32 %v1433_v62 }
 0x2e0   : > { %2572 = vrcp.f32 %v1448_v30  ;;  %v1446_v3 = vadd.f32 1.0, %v2547_v26  ;;  %v1435_v5 = vmul.f32 1.442695, %v1926_v60  ;;  %v1929_v26 = vld [vmem:[%s3292_s6] ss:$0 sm:$0xff] }
 0x2e1   : > { %v2549_v7 = vpop.eup %2548  ;;  %2574 = vpow2.f32 %v1439_v2 }
 0x2e2   : > { %v2551_v57 = vpop.eup %2550  ;;  %2576 = vrcp.f32 %v1446_v3  ;;  %v1491_v63 = vmul.f32 %v2549_v7, %v3140_v44 }
 0x2e3   : > { %v2553_v11 = vpop.eup %2552  ;;  %2578 = vpow2.f32 %v1435_v5  ;;  %v1451_v58 = vadd.f32 1.0, %v2551_v57 }
 0x2e4   : > { %v2555_v61 = vpop.eup %2554  ;;  %v1489_v37 = vmul.f32 %v2553_v11, %v3144_v39 }
 0x2e5   : > { %v2557_v4 = vpop.eup %2556  ;;  %v1449_v6 = vadd.f32 1.0, %v2555_v61 }
 0x2e6   : > { %v2559_v8 = vpop.eup %2558  ;;  %v1492_v10 = vmul.f32 %v2557_v4, %v3148_v53 }
 0x2e7   : > { %v2561_v40 = vpop.eup %2560  ;;  %v1452_v28 = vadd.f32 1.0, %v2559_v8  ;;  %2580 = vrcp.f32 %v1449_v6 }
 0x2e8   : > { %v2563_v1 = vpop.eup %2562  ;;  %v1490_v14 = vmul.f32 %v2561_v40, %v3152_v56  ;;  %v1506_v25 = vpack.c.bf16 %v1492_v10, %v1491_v63 }
 0x2e9   : > { %v2565_v15 = vpop.eup %2564  ;;  %2582 = vrcp.f32 %v1452_v28  ;;  %v1450_v45 = vadd.f32 1.0, %v2563_v1 }
 0x2ea   : > { %v2567_v20 = vpop.eup %2566  ;;  %2584 = vrcp.f32 %v1451_v58  ;;  %v1505_v22 = vpack.c.bf16 %v1490_v14, %v1489_v37  ;;  %v1495_v54 = vmul.f32 %v2565_v15, %v3156_v0 }
 0x2eb   : > { %v2569_v23 = vpop.eup %2568  ;;  %2586 = vrcp.f32 %v1450_v45  ;;  %v1455_v50 = vadd.f32 1.0, %v2567_v20 }
 0x2ec   : > { %v2571_v27 = vpop.eup %2570  ;;  %2404 = vmatprep.mubr.bf16.mxu1 %v1505_v22  ;;  %v1493_v36 = vmul.f32 %v2569_v23, %v3160_v49 }
 0x2ed   : > { %v2573_v53 = vpop.eup %2572  ;;  %v1453_v31 = vadd.f32 1.0, %v2571_v27  ;;  %2405 = vmatmul.mubr.bf16.vlgmr.msra.gmra.mxu1 %v1506_v25 }
 0x2ee   : > { %v2575_v39 = vpop.eup %2574  ;;  %v1496_v34 = vmul.f32 %v2573_v53, %v3164_v35 }
 0x2ef   : > { %v2577_v56 = vpop.eup %2576  ;;  %v1456_v21 = vadd.f32 1.0, %v2575_v39  ;;  %2588 = vrcp.f32 %v1453_v31 }
 0x2f0   : > { %v2579_v44 = vpop.eup %2578  ;;  %v1494_v47 = vmul.f32 %v2577_v56, %v3168_v32  ;;  %v1508_v52 = vpack.c.bf16 %v1496_v34, %v1495_v54 }
 0x2f1   : > { %2590 = vrcp.f32 %v1456_v21  ;;  %v1454_v38 = vadd.f32 1.0, %v2579_v44 }
 0x2f2   : > { %2592 = vrcp.f32 %v1455_v50  ;;  %v1507_v41 = vpack.c.bf16 %v1494_v47, %v1493_v36 }
 0x2f3   : > { %2594 = vrcp.f32 %v1454_v38 }
 0x2f4   : > { %2408 = vmatprep.mubr.bf16.mxu1 %v1507_v41  ;;  %v2581_v12 = vpop.eup %2580 }
 0x2f5   : > { %2409 = vmatmul.mubr.bf16.gmra.mxu1 %v1508_v52  ;;  %v1497_v49 = vmul.f32 %v2581_v12, %v3176_v13 }
 0x2f6   : > { %v2583_v18 = vpop.eup %2582 }
 0x2f7   : > { %v2585_v35 = vpop.eup %2584  ;;  %v1500_v48 = vmul.f32 %v2583_v18, %v3180_v17 }
 0x2f8   : > { %v2587_v16 = vpop.eup %2586  ;;  %v1499_v0 = vmul.f32 %v2585_v35, %v3172_v9 }
 0x2f9   : > { %v1498_v32 = vmul.f32 %v2587_v16, %v3183_v42 }
 0x2fa   : > { %v1510_v24 = vpack.c.bf16 %v1500_v48, %v1499_v0 }
 0x2fb   : > { %v1509_v51 = vpack.c.bf16 %v1498_v32, %v1497_v49 }
 0x2fc   : > { %v2589_v55 = vpop.eup %2588 }
 0x2fd   : > { %2412 = vmatprep.mubr.bf16.mxu1 %v1509_v51  ;;  %v1501_v17 = vmul.f32 %v2589_v55, %v3192_v43 }
 0x2fe   : > { %v2591_v19 = vpop.eup %2590  ;;  %2413 = vmatmul.mubr.bf16.gmra.mxu1 %v1510_v24 }
 0x2ff   : > { %v2593_v59 = vpop.eup %2592  ;;  %v1504_v30 = vmul.f32 %v2591_v19, %v3195_v46 }
 0x300   : > { %v2595_v62 = vpop.eup %2594  ;;  %v1503_v42 = vmul.f32 %v2593_v59, %v3188_v33 }
 0x301   : > { %v1502_v13 = vmul.f32 %v2595_v62, %v3200_v29 }
 0x302   : > { %v1512_v9 = vpack.c.bf16 %v1504_v30, %v1503_v42 }
 0x303   : > { %v1511_v2 = vpack.c.bf16 %v1502_v13, %v1501_v17 }
 0x305   : > { %2416 = vmatprep.mubr.bf16.mxu1 %v1511_v2 }
 0x306   : > { %2417 = vmatmul.mubr.bf16.gmra.mxu1 %v1512_v9 }
 0x3ad   : > { %v2406_v60 = vpop.f32.mrf.mxu1 }
 0x3ae   : > { %v1627_v5 = vadd.f32 %v2406_v60, %v1929_v26 }
 0x3af   : > { %v1618_v3 = vpop.f32.mrf.mxu1 }
 0x3b0   : > { %v1619_v29 = vadd.f32 %v1929_v26, %v1618_v3 }
 0x3b1   : > { %v2407_v46 = vpop.f32.mrf.mxu1 }
 0x3b2   : > { %v1630_v43 = vadd.f32 %v2407_v46, %v1929_v26 }
 0x3b3   : > { %v1621_v7 = vpop.f32.mrf.mxu1 }
 0x3b4   : > { %v2016_v57 = vpack.c.bf16 %v1630_v43, %v1627_v5  ;;  %v1622_v33 = vadd.f32 %v1929_v26, %v1621_v7 }
 0x3b5   : > { %v2410_v11 = vpop.f32.mrf.mxu1 }
 0x3b6   : > { %2055 = vst [vmem:[%s3225_s16 + $0x8] sm:$0xff] %v2016_v57   ;;  %v2011_v61 = vpack.c.bf16 %v1622_v33, %v1619_v29  ;;  %v1643_v8 = vadd.f32 %v2410_v11, %v1929_v26 }
 0x3b7   : > { %v1634_v4 = vpop.f32.mrf.mxu1 }
 0x3b8   : > { %2012 = vst [vmem:[%s3225_s16] sm:$0xff] %v2011_v61   ;;  %v1635_v10 = vadd.f32 %v1929_v26, %v1634_v4 }
 0x3b9   : > { %v2411_v6 = vpop.f32.mrf.mxu1 }
 0x3ba   : > { %v1646_v58 = vadd.f32 %v2411_v6, %v1929_v26 }
 0x3bb   : > { %v1637_v40 = vpop.f32.mrf.mxu1 }
 0x3bc   : > { %v2026_v28 = vpack.c.bf16 %v1646_v58, %v1643_v8  ;;  %v1638_v1 = vadd.f32 %v1929_v26, %v1637_v40 }
 0x3be   : > { %2057 = vst [vmem:[%s3225_s16 + $0x18] sm:$0xff] %v2026_v28   ;;  %v2021_v37 = vpack.c.bf16 %v1638_v1, %v1635_v10  ;;  %v2414_v14 = vpop.f32.mrf.mxu1 }
 0x3bf   : > { %v1659_v45 = vadd.f32 %v2414_v14, %v1929_v26 }
 0x3c0   : > { %2056 = vst [vmem:[%s3225_s16 + $0x10] sm:$0xff] %v2021_v37   ;;  %v1650_v15 = vpop.f32.mrf.mxu1 }
 0x3c1   : > { %v1651_v23 = vadd.f32 %v1929_v26, %v1650_v15 }
 0x3c2   : > { %v2415_v63 = vpop.f32.mrf.mxu1 }
 0x3c3   : > { %v1662_v20 = vadd.f32 %v2415_v63, %v1929_v26 }
 0x3c4   : > { %v1653_v22 = vpop.f32.mrf.mxu1 }
 0x3c5   : > { %v2036_v25 = vpack.c.bf16 %v1662_v20, %v1659_v45  ;;  %v1654_v27 = vadd.f32 %v1929_v26, %v1653_v22 }
 0x3c6   : > { %v2418_v53 = vpop.f32.mrf.mxu1 }
 0x3c7   : > { %2059 = vst [vmem:[%s3225_s16 + $0x28] sm:$0xff] %v2036_v25   ;;  %v2031_v31 = vpack.c.bf16 %v1654_v27, %v1651_v23  ;;  %v1675_v56 = vadd.f32 %v2418_v53, %v1929_v26 }
 0x3c8   : > { %v1666_v39 = vpop.f32.mrf.mxu1 }
 0x3c9   : > { %2058 = vst [vmem:[%s3225_s16 + $0x20] sm:$0xff] %v2031_v31   ;;  %v1667_v44 = vadd.f32 %v1929_v26, %v1666_v39 }
 0x3ca   : > { %v2419_v50 = vpop.f32.mrf.mxu1 }
 0x3cb   : > { %v1678_v34 = vadd.f32 %v2419_v50, %v1929_v26 }
 0x3cc   : > { %v1669_v21 = vpop.f32.mrf.mxu1 }
 0x3cd   : > { %v2046_v36 = vpack.c.bf16 %v1678_v34, %v1675_v56  ;;  %v1670_v47 = vadd.f32 %v1929_v26, %v1669_v21 }
 0x3cf   : > { %2061 = vst [vmem:[%s3225_s16 + $0x38] sm:$0xff] %v2046_v36   ;;  %v2041_v54 = vpack.c.bf16 %v1670_v47, %v1667_v44 }
 0x3d1   : > { %2060 = vst [vmem:[%s3225_s16 + $0x30] sm:$0xff] %v2041_v54  }
 0x3d2   : > { %2661 = shalt.err (!%p2658_p3)
}
 0x3d3   : > { %s2662_s9 = scalar_lea.hbm %s3240_s21, 1024  ;;  %s2666_s17 = scalar_lea.hbm %s3293_s7, 2048 }
 0x3d4   : > { %p2663_p2 = scmp.ne.s32.totalorder %s3240_s21, %s2662_s9  ;;  %p2667_p7 = scmp.lt.s32.totalorder %s3240_s21, %s3293_s7 }
 0x3d5   : > { %p2668_p6 = scmp.lt.s32.totalorder %s2666_s17, %s2662_s9 }
 0x3d6   : > { %p2664_p4 = pnand %p2663_p2, %p2803_p5 }
 0x3d7   : > { %p2669_p9 = por %p2668_p6, %p2667_p7 }
 0x3d8   : > { %p2665_p13 = pneg %p2664_p4 }
 0x3da   : > { %p2670_p10 = pnand %p2669_p9, %p2665_p13 }
 0x3dc   : > { %2673 = shalt.err (!%p2670_p10)
}
 0x3dd   : > { %s2723_s14 = smov 64   ;;  %s2724_s20 = smov 4  }
 0x3de   : > { %2428 = dma.vmem_to_hbm [thread:$0]  (%p2803_p5), %s3235_s18, 1024, %s3240_s21, %s3246_s22, %s2723_s14, %s2723_s14, %s2724_s20  }
 0x3df PF: > { %p2445_p12 = scmp.ge.s32.totalorder %s2716_s27, 2  ;;  %s1790_s28 = sand.u32 1, %s2704_s24  }
 0x3e0   : > { %p3303_p8 = scmp.ne.s32.totalorder %s3296_s12, 0  ;;  %s1791_s23 = scalar_lea.sflag [#allocation4], %s1790_s28 }
 0x3e2   : > { %p2438_p11 = pnand %p2445_p12, %p3303_p8 }
 0x3e4   : > { %p2439_p0 = pneg %p2438_p11 }
 0x3e6   : > { %2699 = dma.done.wait (%p2439_p0), %s1791_s23, 1024  }
 0x3e7   : > { %2701 = vsyncadd (%p2439_p0), %s1791_s23, 4294966272  ;;  %p19_p1 = scmp.ge.s32.totalorder %s2790_s30, 4   ;;  %s3304_s24 = smov %s2708_s25 }
 0x3e8   : > { %s3305_s25 = smov %s2712_s26  ;;  %s3306_s26 = smov %s2801_s10 }
 0x3e9   : > { %s3307_s27 = smov %s2790_s30  ;;  %21 = sbr.rel (!%p19_p1) target bundleno = 5 (0x5), region = 92 }
 0x3ee   :  { %1796 = vsyncpa [#allocation3], 1 }
 0x3ef   :  { %1798 = vsyncpa [#allocation3 + $0x1], 1 }
 0x3f0   :  { %1799 = vsyncpa [#allocation6], 1 }
 0x3f1   :  { %1800 = vsyncpa [#allocation4], 1 }
 0x3f2   :  { %1802 = vsyncpa [#allocation4 + $0x1], 1 }

// kernel: tpu_custom_call.1
= control target key start
LH: loop header
LB: loop body
LE: loop exit
PB: predicated region body
PF: predicated region fallthrough
CT: control target
= control target key end

     0   :  { %12 = vsyncpa [#allocation3], 0  ;;  %s3286_s0 = inlined_call_operand.vmem [shape: bf16[250,128], index: 0, kind: input, shape index: {}]   ;;  %s3287_s1 = inlined_call_operand.vmem [shape: f32[128,4], index: 1, kind: input, shape index: {}]   ;;  %s3288_s2 = inlined_call_operand.vmem [shape: f32[4,128], index: 2, kind: input, shape index: {}]   ;;  %s3289_s3 = inlined_call_operand.hbm [shape: bf16[128,128], index: 3, kind: input, shape index: {}]   ;;  %s3290_s4 = inlined_call_operand.vmem [shape: f32[1,128], index: 4, kind: input, shape index: {}]   ;;  %s3291_s5 = inlined_call_operand.hbm [shape: bf16[128,128], index: 5, kind: input, shape index: {}]   ;;  %s3292_s6 = inlined_call_operand.vmem [shape: f32[1,128], index: 6, kind: input, shape index: {}]   ;;  %s3293_s7 = inlined_call_operand.hbm [shape: bf16[250,128], index: 7, kind: output, shape index: {}]  }
   0x1   :  { %13 = vsyncpa [#allocation6], 0 }
   0x2   :  { %14 = vsyncpa [#allocation4], 0 }
   0x3   :  { %16 = vsyncpa [#allocation4 + $0x1], 0  ;;  %s2765_s24 = smov 0   ;;  %s2767_s25 = smov 0  }
   0x4   :  { %s2769_s26 = smov 0   ;;  %s2771_s27 = smov 0  }
   0x5 LB: > { %s2786_s28 = sadd.s32 4294967295, %s2716_s27   ;;  %s1859_s29 = sadd.s32 4294967294, %s2716_s27   ;;  %s2716_s27 = sphi %s2771_s27, %s3307_s27   ;;  %s2712_s26 = sphi %s2769_s26, %s3306_s26   ;;  %s2708_s25 = sphi %s2767_s25, %s3305_s25   ;;  %s2704_s24 = sphi %s2765_s24, %s3304_s24  }
   0x6   : > { %s2790_s30 = sadd.s32 1, %s2716_s27   ;;  %s181_s8 = sadd.s32 1, %s2712_s26 }
   0x7   : > { %s178_s9 = ssub.s32 %s2716_s27, %s2790_s30  ;;  %p191_p0 = scmp.ne.s32.totalorder %s2712_s26, %s2708_s25 }
   0x8   : > { %p179_p1 = scmp.eq.s32.totalorder %s178_s9, 0  ;;  %p192_p2 = scmp.eq.s32.totalorder %s2786_s28, 1 }
   0x9   : > { %p197_p3 = scmp.ne.s32.totalorder %s2708_s25, %s2704_s24  ;;  %p198_p4 = scmp.eq.s32.totalorder %s1859_s29, 1 }
   0xa   : > { %s2801_s10 = scalar_select %p179_p1, %s2712_s26, %s181_s8  }
   0xb   : > { %p2803_p5 = por %p192_p2, %p191_p0  ;;  %p2807_p6 = por %p198_p4, %p197_p3 }
   0xc   : > { %p1860_p7 = scmp.ge.s32.totalorder %s2716_s27, 1  ;;  %p205_p8 = scmp.lt.s32.totalorder %s2716_s27, 3 }
   0xd   : > { %s3296_s12 = scalar_select %p2807_p6, 1, 0 }
   0xe   : > { %p3294_p9 = scmp.eq.s32.totalorder %s2786_s28, 0  ;;  %p2814_p10 = pnand %p1860_p7, %p205_p8 }
   0xf   : > { %s2718_s14 = smov [#allocation2]   ;;  %s2719_s17 = smov [#allocation5]  }
  0x10   : > { %s223_s15 = sshll.u32 %s2718_s14, 4  ;;  %p2430_p11 = pneg %p2814_p10  ;;  %s224_s15 = int_to_ptr.vmem [resolvable:$true] %s223_s15 }
  0x11   : > { %s239_s18 = sshll.u32 %s2719_s17, 4  ;;  %s2607_s19 = scalar_lea.vmem %s224_s15, 1024  ;;  %s240_s18 = int_to_ptr.vmem [resolvable:$true] %s239_s18 }
  0x12   : > { %p2822_p12 = pnand %p3294_p9, %p2430_p11  ;;  %p2608_p0 = scmp.ne.s32.totalorder %s224_s15, %s2607_s19 }
  0x13   : > { %p2615_p3 = scmp.lt.s32.totalorder %s224_s15, %s224_s15  ;;  %p2616_p4 = scmp.lt.s32.totalorder %s2607_s19, %s2607_s19 }
  0x14   : > { %p2598_p13 = pneg %p2822_p12 }
  0x15   : > { %p2617_p7 = por %p2616_p4, %p2615_p3 }
  0x16   : > { %p2610_p1 = pnand %p2608_p0, %p2598_p13 }
  0x18   : > { %p2611_p2 = pneg %p2610_p1 }
  0x1a   : > { %p2618_p8 = pnand %p2617_p7, %p2611_p2 }
  0x1c   : > { %2621 = shalt.err (!%p2618_p8)
}
  0x1d   : > { %s2720_s20 = smov 64   ;;  %s2721_s21 = smov 4  }
  0x1e   : > { %2433 = dma.hbm_to_vmem [thread:$0]  (!%p2822_p12), %s3289_s3, 1024, %s224_s15, [#allocation3], %s2720_s20, %s2720_s20, %s2721_s21  }
  0x1f   : > { %s2633_s29 = scalar_lea.vmem %s240_s18, 1024  ;;  %p2641_p9 = scmp.lt.s32.totalorder %s240_s18, %s240_s18 }
  0x20   : > { %p2634_p11 = scmp.ne.s32.totalorder %s240_s18, %s2633_s29  ;;  %p2642_p6 = scmp.lt.s32.totalorder %s2633_s29, %s2633_s29 }
  0x22   : > { %p2636_p0 = pnand %p2634_p11, %p2598_p13  ;;  %p2643_p3 = por %p2642_p6, %p2641_p9 }
  0x24   : > { %p2637_p1 = pneg %p2636_p0 }
  0x26   : > { %p2644_p2 = pnand %p2643_p3, %p2637_p1 }
  0x28   : > { %2647 = shalt.err (!%p2644_p2)
}
  0x29   : > { %2436 = dma.hbm_to_vmem [thread:$0]  (!%p2822_p12), %s3291_s5, 1024, %s240_s18, [#allocation6], %s2720_s20, %s2720_s20, %s2721_s21  }
  0x2a   : > { %267 = sbr.rel (%p2814_p10) target bundleno = 991 (0x3df), region = 48  ;;  %p3299_p4 = scmp.eq.s32.totalorder (!%p2814_p10), %s2786_s28, 0 }
  0x2f   : > { %2691 = dma.done.wait (%p3299_p4), [#allocation3], 1024   ;;  %p3300_p13 = pmov %p3299_p4 }
  0x30   : > { %p3301_p7 = pmov %p3299_p4 }
  0x31   : > { %2693 = vsyncadd (%p3300_p13), [#allocation3], 4294966272 }
  0x32   : > { %2695 = dma.done.wait (%p3301_p7), [#allocation6], 1024   ;;  %p3302_p6 = pmov %p3299_p4 }
  0x33   : > { %s1868_s14 = sshll.u32 %s2786_s28, 4  ;;  %v358_v0 = vld [vmem:[%s3287_s1 + $0x78] sm:$0xff]  ;;  %v357_v1 = vld [vmem:[%s3287_s1 + $0x70] sm:$0xff]  ;;  %v356_v2 = vld [vmem:[%s3287_s1 + $0x68] sm:$0xff]  ;;  %vm795_vm0 = vcmask 1043456   ;;  %vm746_vm1 = vcmask 31744  }
  0x34   : > { %2697 = vsyncadd (%p3302_p6), [#allocation6], 4294966272  ;;  %p304_p9 = scmp.lt.s32.totalorder %s1868_s14, 31  ;;  %2192 = vmatprep.subr.mxu0 %v358_v0  ;;  %2248 = vmatprep.subr.mxu1 %v358_v0  ;;  %v355_v3 = vld [vmem:[%s3287_s1 + $0x60] sm:$0xff]  ;;  %v354_v4 = vld [vmem:[%s3287_s1 + $0x58] sm:$0xff]  ;;  %s300_s9 = sand.u32 1, %s2708_s25  }
  0x35   : > { %2193 = vmatpush3.msra.mxu0 %v358_v0  ;;  %2249 = vmatpush3.msra.mxu1 %v358_v0  ;;  %v353_v5 = vld [vmem:[%s3287_s1 + $0x50] sm:$0xff]  ;;  %v352_v6 = vld [vmem:[%s3287_s1 + $0x48] sm:$0xff]  ;;  %v351_v7 = vld [vmem:[%s3287_s1 + $0x40] sm:$0xff]  ;;  %s1867_s17 = sshll.u32 %s300_s9, 6  ;;  %s1975_s19 = sshll.u32 %s2786_s28, 10 }
  0x36   : > { %2194 = vmatprep.subr.mxu0 %v357_v1  ;;  %2250 = vmatprep.subr.mxu1 %v357_v1  ;;  %s3309_s14 = smov (!%p304_p9, %s1868_s14), 31  ;;  %v350_v8 = vld [vmem:[%s3287_s1 + $0x38] sm:$0xff]  ;;  %v349_v9 = vld [vmem:[%s3287_s1 + $0x30] sm:$0xff]  ;;  %v348_v10 = vld [vmem:[%s3287_s1 + $0x28] sm:$0xff]  ;;  %s3240_s21 = scalar_lea.hbm %s3293_s7, %s1975_s19 }
  0x37   : > { %2195 = vmatpush3.msra.mxu0 %v357_v1  ;;  %2251 = vmatpush3.msra.mxu1 %v357_v1  ;;  %s1869_s16 = sshll.u32 %s3309_s14, 2  ;;  %v347_v11 = vld [vmem:[%s3287_s1 + $0x20] sm:$0xff]  ;;  %v346_v12 = vld [vmem:[%s3287_s1 + $0x18] sm:$0xff]  ;;  %v345_v14 = vld [vmem:[%s3287_s1 + $0x10] sm:$0xff]  ;;  %s3246_s22 = scalar_lea.sflag [#allocation4], %s300_s9 }
  0x38   : > { %2196 = vmatprep.subr.mxu0 %v356_v2  ;;  %2252 = vmatprep.subr.mxu1 %v356_v2  ;;  %s2894_s8 = scalar_lea.vmem %s3286_s0, %s1869_s16  ;;  %v344_v17 = vld [vmem:[%s3287_s1 + $0x8] sm:$0xff]  ;;  %v343_v20 = vld [vmem:[%s3287_s1] sm:$0xff]  ;;  %v3002_v57 = vld [vmem:[#allocation2 + $0x38] sm:$0xff]   ;;  %s3225_s16 = scalar_lea.vmem [#allocation7], %s1867_s17 }
  0x39   : > { %2197 = vmatpush3.msra.mxu0 %v356_v2  ;;  %2253 = vmatpush3.msra.mxu1 %v356_v2  ;;  %v1977_v13 = vld [vmem:[%s2894_s8] sm:$0xff]   ;;  %v2048_v15 = vld [vmem:[%s2894_s8 + $0x8] sm:$0xff]   ;;  %v2049_v21 = vld [vmem:[%s2894_s8 + $0x10] sm:$0xff]   ;;  %s1775_s18 = sshll.u32 %s3225_s16, 4  ;;  %s2722_s23 = smov [#allocation7]   ;;  %s3235_s18 = int_to_ptr.vmem [resolvable:$true] %s1775_s18 }
  0x3a   : > { %2198 = vmatprep.subr.mxu0 %v355_v3  ;;  %2254 = vmatprep.subr.mxu1 %v355_v3  ;;  %v2907_v16 = vunpack.c.l.bf16 %v1977_v13  ;;  %v2912_v18 = vunpack.c.h.bf16 %v1977_v13  ;;  %v2914_v19 = vunpack.c.l.bf16 %v2048_v15  ;;  %v2924_v24 = vunpack.c.h.bf16 %v2048_v15  ;;  %v2050_v27 = vld [vmem:[%s2894_s8 + $0x18] sm:$0xff]   ;;  %v745_v28 = vld [vmem:[%s3288_s2] sm:$0xf]  ;;  %v2052_v38 = vld [vmem:[%s2894_s8 + $0x28] sm:$0xff]   ;;  %s2648_s28 = scalar_lea.vmem %s3235_s18, 1024  ;;  %s2652_s29 = sshll.u32 %s2722_s23, 4  ;;  %s2653_s29 = int_to_ptr.vmem [resolvable:$false] %s2652_s29 }
  0x3b   : > { %2199 = vmatpush3.msra.mxu0 %v355_v3  ;;  %2255 = vmatpush3.msra.mxu1 %v355_v3  ;;  %v2928_v26 = vunpack.c.l.bf16 %v2049_v21  ;;  %v2938_v30 = vunpack.c.h.bf16 %v2049_v21  ;;  %v2943_v32 = vunpack.c.l.bf16 %v2050_v27  ;;  %v2051_v33 = vld [vmem:[%s2894_s8 + $0x20] sm:$0xff]   ;;  %v2949_v35 = vunpack.c.h.bf16 %v2050_v27  ;;  %v2053_v43 = vld [vmem:[%s2894_s8 + $0x30] sm:$0xff]   ;;  %v2054_v48 = vld [vmem:[%s2894_s8 + $0x38] sm:$0xff]   ;;  %p2649_p10 = scmp.ne.s32.totalorder %s3235_s18, %s2648_s28  ;;  %s2654_s8 = scalar_lea.vmem %s2653_s29, 2048 }
  0x3c   : > { %2200 = vmatprep.subr.mxu0 %v354_v4  ;;  %2256 = vmatprep.subr.mxu1 %v354_v4  ;;  %v504_v22 = vmul.f32 %v2907_v16, %v2907_v16  ;;  %v505_v23 = vmul.f32 %v2912_v18, %v2912_v18  ;;  %v506_v25 = vmul.f32 %v2914_v19, %v2914_v19  ;;  %v2954_v37 = vunpack.c.l.bf16 %v2051_v33  ;;  %p2655_p11 = scmp.lt.s32.totalorder %s3235_s18, %s2653_s29  ;;  %p2656_p0 = scmp.lt.s32.totalorder %s2654_s8, %s2648_s28 }
  0x3d   : > { %2201 = vmatpush3.msra.mxu0 %v354_v4  ;;  %2257 = vmatpush3.msra.mxu1 %v354_v4  ;;  %v507_v29 = vmul.f32 %v2924_v24, %v2924_v24  ;;  %v508_v31 = vmul.f32 %v2928_v26, %v2928_v26  ;;  %v509_v34 = vmul.f32 %v2938_v30, %v2938_v30  ;;  %v2960_v40 = vunpack.c.h.bf16 %v2051_v33  ;;  %p2650_p12 = pnand %p2649_p10, %p2803_p5 }
  0x3e   : > { %2202 = vmatprep.subr.mxu0 %v353_v5  ;;  %2258 = vmatprep.subr.mxu1 %v353_v5  ;;  %v510_v36 = vmul.f32 %v2943_v32, %v2943_v32  ;;  %v511_v39 = vmul.f32 %v2949_v35, %v2949_v35  ;;  %v512_v41 = vmul.f32 %v2954_v37, %v2954_v37  ;;  %v2965_v42 = vunpack.c.l.bf16 %v2052_v38  ;;  %p2657_p1 = por %p2656_p0, %p2655_p11 }
  0x3f   : > { %2203 = vmatpush3.msra.mxu0 %v353_v5  ;;  %2259 = vmatpush3.msra.mxu1 %v353_v5  ;;  %v513_v44 = vmul.f32 %v2960_v40, %v2960_v40  ;;  %v2971_v45 = vunpack.c.h.bf16 %v2052_v38  ;;  %v2976_v47 = vunpack.c.l.bf16 %v2053_v43  ;;  %v2982_v50 = vunpack.c.h.bf16 %v2053_v43  ;;  %p2651_p8 = pneg %p2650_p12 }
  0x40   : > { %2204 = vmatprep.subr.mxu0 %v352_v6  ;;  %2260 = vmatprep.subr.mxu1 %v352_v6  ;;  %v514_v46 = vmul.f32 %v2965_v42, %v2965_v42  ;;  %v2987_v52 = vunpack.c.l.bf16 %v2054_v48  ;;  %v2992_v54 = vunpack.c.h.bf16 %v2054_v48 }
  0x41   : > { %2205 = vmatpush3.msra.mxu0 %v352_v6  ;;  %2261 = vmatpush3.msra.mxu1 %v352_v6  ;;  %v515_v49 = vmul.f32 %v2971_v45, %v2971_v45  ;;  %v516_v51 = vmul.f32 %v2976_v47, %v2976_v47  ;;  %v517_v53 = vmul.f32 %v2982_v50, %v2982_v50  ;;  %p2658_p3 = pnand %p2657_p1, %p2651_p8 }
  0x42   : > { %2206 = vmatprep.subr.mxu0 %v351_v7  ;;  %2262 = vmatprep.subr.mxu1 %v351_v7  ;;  %v518_v55 = vmul.f32 %v2987_v52, %v2987_v52  ;;  %v519_v56 = vmul.f32 %v2992_v54, %v2992_v54 }
  0x43   : > { %2207 = vmatpush3.msra.mxu0 %v351_v7  ;;  %2263 = vmatpush3.msra.mxu1 %v351_v7 }
  0x44   : > { %2208 = vmatprep.subr.mxu0 %v350_v8  ;;  %2264 = vmatprep.subr.mxu1 %v350_v8 }
  0x45   : > { %2209 = vmatpush3.msra.mxu0 %v350_v8  ;;  %2265 = vmatpush3.msra.mxu1 %v350_v8 }
  0x46   : > { %2210 = vmatprep.subr.mxu0 %v349_v9  ;;  %2266 = vmatprep.subr.mxu1 %v349_v9 }
  0x47   : > { %2211 = vmatpush3.msra.mxu0 %v349_v9  ;;  %2267 = vmatpush3.msra.mxu1 %v349_v9 }
  0x48   : > { %2212 = vmatprep.subr.mxu0 %v348_v10  ;;  %2268 = vmatprep.subr.mxu1 %v348_v10 }
  0x49   : > { %2213 = vmatpush3.msra.mxu0 %v348_v10  ;;  %2269 = vmatpush3.msra.mxu1 %v348_v10 }
  0x4a   : > { %2214 = vmatprep.subr.mxu0 %v347_v11  ;;  %2270 = vmatprep.subr.mxu1 %v347_v11 }
  0x4b   : > { %2215 = vmatpush3.msra.mxu0 %v347_v11  ;;  %2271 = vmatpush3.msra.mxu1 %v347_v11 }
  0x4c   : > { %2216 = vmatprep.subr.mxu0 %v346_v12  ;;  %2272 = vmatprep.subr.mxu1 %v346_v12 }
  0x4d   : > { %2217 = vmatpush3.msra.mxu0 %v346_v12  ;;  %2273 = vmatpush3.msra.mxu1 %v346_v12 }
  0x4e   : > { %2218 = vmatprep.subr.mxu0 %v345_v14  ;;  %2274 = vmatprep.subr.mxu1 %v345_v14 }
  0x4f   : > { %2219 = vmatpush3.msra.mxu0 %v345_v14  ;;  %2275 = vmatpush3.msra.mxu1 %v345_v14 }
  0x50   : > { %2220 = vmatprep.subr.mxu0 %v344_v17  ;;  %2276 = vmatprep.subr.mxu1 %v344_v17 }
  0x51   : > { %2221 = vmatpush3.msra.mxu0 %v344_v17  ;;  %2277 = vmatpush3.msra.mxu1 %v344_v17 }
  0x52   : > { %2222 = vmatprep.subr.mxu0 %v343_v20  ;;  %2278 = vmatprep.subr.mxu1 %v343_v20 }
  0x53   : > { %2223 = vmatpush3.msra.mxu0 %v343_v20  ;;  %2224 = vmatprep.mubr.f32.mxu0 %v2907_v16 }
  0x54   : > { %2279 = vmatpush3.msra.mxu1 %v343_v20  ;;  %2280 = vmatprep.mubr.f32.mxu1 %v504_v22 }
  0x55   : > { %2225 = vmatmul.mubr.f32.vlgmr.msra.gmra.mxu0 %v2912_v18  ;;  %2281 = vmatmul.mubr.f32.vlgmr.msra.gmra.mxu1 %v505_v23 }
  0x56   : > { %2227 = vmatprep.mubr.f32.mxu0 %v2914_v19  ;;  %2283 = vmatprep.mubr.f32.mxu1 %v506_v25 }
  0x57   : > { %2304 = vmatprep.subr.msk.mxu0 %vm795_vm0, %v745_v28  ;;  %2330 = vmatprep.subr.msk.mxu1 %vm795_vm0, %v745_v28 }
  0x58   : > { %2305 = vmatpush3.msk.msra.mxu0 %vm795_vm0, %v745_v28  ;;  %2331 = vmatpush3.msk.msra.mxu1 %vm795_vm0, %v745_v28 }
  0x59   : > { %2228 = vmatmul.mubr.f32.gmra.mxu0 %v2924_v24  ;;  %2284 = vmatmul.mubr.f32.gmra.mxu1 %v507_v29 }
  0x5a   : > { %2230 = vmatprep.mubr.f32.mxu0 %v2928_v26  ;;  %2286 = vmatprep.mubr.f32.mxu1 %v508_v31 }
  0x5b   : > { %2356 = vmatprep.subr.bf16.mxu0 %v3002_v57 }
  0x5d   : > { %2231 = vmatmul.mubr.f32.gmra.mxu0 %v2938_v30  ;;  %2287 = vmatmul.mubr.f32.gmra.mxu1 %v509_v34 }
  0x5e   : > { %2233 = vmatprep.mubr.f32.mxu0 %v2943_v32  ;;  %2289 = vmatprep.mubr.f32.mxu1 %v510_v36 }
  0x61   : > { %2234 = vmatmul.mubr.f32.gmra.mxu0 %v2949_v35  ;;  %2290 = vmatmul.mubr.f32.gmra.mxu1 %v511_v39 }
  0x62   : > { %2236 = vmatprep.mubr.f32.mxu0 %v2954_v37  ;;  %2292 = vmatprep.mubr.f32.mxu1 %v512_v41 }
  0x65   : > { %2237 = vmatmul.mubr.f32.gmra.mxu0 %v2960_v40  ;;  %2293 = vmatmul.mubr.f32.gmra.mxu1 %v513_v44 }
  0x66   : > { %2239 = vmatprep.mubr.f32.mxu0 %v2965_v42  ;;  %2295 = vmatprep.mubr.f32.mxu1 %v514_v46 }
  0x69   : > { %2240 = vmatmul.mubr.f32.gmra.mxu0 %v2971_v45  ;;  %2296 = vmatmul.mubr.f32.gmra.mxu1 %v515_v49 }
  0x6a   : > { %2242 = vmatprep.mubr.f32.mxu0 %v2976_v47  ;;  %2298 = vmatprep.mubr.f32.mxu1 %v516_v51 }
  0x6d   : > { %2243 = vmatmul.mubr.f32.gmra.mxu0 %v2982_v50  ;;  %2299 = vmatmul.mubr.f32.gmra.mxu1 %v517_v53 }
  0x6e   : > { %2245 = vmatprep.mubr.f32.mxu0 %v2987_v52  ;;  %2301 = vmatprep.mubr.f32.mxu1 %v518_v55 }
  0x71   : > { %2246 = vmatmul.mubr.f32.gmra.mxu0 %v2992_v54  ;;  %2302 = vmatmul.mubr.f32.gmra.mxu1 %v519_v56 }
 0x115   : > { %v3005_v58 = vpop.f32.mrf.mxu0  ;;  %v2282_v59 = vpop.f32.mrf.mxu1 }
 0x116   : > { %v666_v60 = vmul.f32 %v3005_v58, %v3005_v58 }
 0x117   : > { %v3009_v61 = vpop.f32.mrf.mxu0  ;;  %v586_v62 = vpop.f32.mrf.mxu1 }
 0x118   : > { %v682_v63 = vsub.f32 %v2282_v59, %v666_v60  ;;  %v665_v0 = vmul.f32 %v3009_v61, %v3009_v61 }
 0x119   : > { %v3013_v1 = vpop.f32.mrf.mxu0  ;;  %v2285_v2 = vpop.f32.mrf.mxu1 }
 0x11a   : > { %v698_v3 = vmax.f32 %v682_v63, 0.0  ;;  %v681_v4 = vsub.f32 %v586_v62, %v665_v0  ;;  %v668_v5 = vmul.f32 %v3013_v1, %v3013_v1 }
 0x11b   : > { %v3017_v6 = vpop.f32.mrf.mxu0  ;;  %v596_v7 = vpop.f32.mrf.mxu1 }
 0x11c   : > { %v714_v8 = vadd.f32 1e-05, %v698_v3  ;;  %v697_v9 = vmax.f32 %v681_v4, 0.0  ;;  %v684_v10 = vsub.f32 %v2285_v2, %v668_v5  ;;  %v667_v11 = vmul.f32 %v3017_v6, %v3017_v6 }
 0x11d   : > { %v3021_v12 = vpop.f32.mrf.mxu0  ;;  %v2288_v13 = vpop.f32.mrf.mxu1 }
 0x11e   : > { %v713_v14 = vadd.f32 1e-05, %v697_v9  ;;  %v700_v15 = vmax.f32 %v684_v10, 0.0  ;;  %v683_v17 = vsub.f32 %v596_v7, %v667_v11  ;;  %2500 = vrsqrt.f32 %v714_v8 }
 0x11f   : > { %v670_v20 = vmul.f32 %v3021_v12, %v3021_v12  ;;  %v3025_v21 = vpop.f32.mrf.mxu0  ;;  %v606_v22 = vpop.f32.mrf.mxu1 }
 0x120   : > { %2502 = vrsqrt.f32 %v713_v14  ;;  %v716_v23 = vadd.f32 1e-05, %v700_v15  ;;  %v699_v25 = vmax.f32 %v683_v17, 0.0  ;;  %v669_v27 = vmul.f32 %v3025_v21, %v3025_v21 }
 0x121   : > { %v686_v28 = vsub.f32 %v2288_v13, %v670_v20  ;;  %v3029_v29 = vpop.f32.mrf.mxu0  ;;  %v2291_v31 = vpop.f32.mrf.mxu1 }
 0x122   : > { %v715_v33 = vadd.f32 1e-05, %v699_v25  ;;  %v685_v34 = vsub.f32 %v606_v22, %v669_v27  ;;  %v672_v36 = vmul.f32 %v3029_v29, %v3029_v29  ;;  %2504 = vrsqrt.f32 %v716_v23 }
 0x123   : > { %v702_v38 = vmax.f32 %v686_v28, 0.0  ;;  %v3033_v39 = vpop.f32.mrf.mxu0  ;;  %v616_v41 = vpop.f32.mrf.mxu1  ;;  %v945_v22 = vsub.f32 0.0, %v3005_v58  ;;  %v944_v23 = vsub.f32 0.0, %v3009_v61 }
 0x124   : > { %2506 = vrsqrt.f32 %v715_v33  ;;  %v701_v43 = vmax.f32 %v685_v34, 0.0  ;;  %v688_v44 = vsub.f32 %v2291_v31, %v672_v36  ;;  %v671_v46 = vmul.f32 %v3033_v39, %v3033_v39  ;;  %v2485_v33 = vld [vmem:[#allocation2 + $0x30] sm:$0xff]  }
 0x125   : > { %v718_v48 = vadd.f32 1e-05, %v702_v38  ;;  %v3037_v49 = vpop.f32.mrf.mxu0  ;;  %v2294_v51 = vpop.f32.mrf.mxu1 }
 0x126   : > { %v717_v53 = vadd.f32 1e-05, %v701_v43  ;;  %v704_v55 = vmax.f32 %v688_v44, 0.0  ;;  %v687_v56 = vsub.f32 %v616_v41, %v671_v46  ;;  %v674_v59 = vmul.f32 %v3037_v49, %v3037_v49 }
 0x127   : > { %2508 = vrsqrt.f32 %v718_v48  ;;  %v3041_v60 = vpop.f32.mrf.mxu0  ;;  %v626_v62 = vpop.f32.mrf.mxu1 }
 0x128   : > { %2510 = vrsqrt.f32 %v717_v53  ;;  %v720_v63 = vadd.f32 1e-05, %v704_v55  ;;  %v703_v0 = vmax.f32 %v687_v56, 0.0  ;;  %v690_v2 = vsub.f32 %v2294_v51, %v674_v59 }
 0x129   : > { %v673_v3 = vmul.f32 %v3041_v60, %v3041_v60  ;;  %v3045_v4 = vpop.f32.mrf.mxu0  ;;  %v2297_v5 = vpop.f32.mrf.mxu1  ;;  %v947_v56 = vsub.f32 0.0, %v3013_v1  ;;  %v946_v59 = vsub.f32 0.0, %v3017_v6 }
 0x12a   : > { %v719_v7 = vadd.f32 1e-05, %v703_v0  ;;  %v706_v8 = vmax.f32 %v690_v2, 0.0  ;;  %v676_v9 = vmul.f32 %v3045_v4, %v3045_v4  ;;  %2512 = vrsqrt.f32 %v720_v63  ;;  %v2486_v2 = vld [vmem:[#allocation2 + $0x28] sm:$0xff]  }
 0x12b   : > { %v689_v10 = vsub.f32 %v626_v62, %v673_v3  ;;  %v3049_v11 = vpop.f32.mrf.mxu0  ;;  %v636_v13 = vpop.f32.mrf.mxu1 }
 0x12c   : > { %v2501_v14 = vpop.eup %2500  ;;  %2514 = vrsqrt.f32 %v719_v7  ;;  %v722_v15 = vadd.f32 1e-05, %v706_v8  ;;  %v692_v17 = vsub.f32 %v2297_v5, %v676_v9  ;;  %v675_v27 = vmul.f32 %v3049_v11, %v3049_v11 }
 0x12d   : > { %v2503_v20 = vpop.eup %2502  ;;  %v705_v25 = vmax.f32 %v689_v10, 0.0  ;;  %v3055_v28 = vpop.f32.mrf.mxu0  ;;  %v961_v38 = vmul.f32 %v2501_v14, %v945_v22 }
 0x12e   : > { %v2300_v31 = vpop.f32.mrf.mxu1  ;;  %v708_v34 = vmax.f32 %v692_v17, 0.0  ;;  %v678_v36 = vmul.f32 %v3055_v28, %v3055_v28  ;;  %2306 = vmatprep.mubr.msk.f32.mxu0 %vm746_vm1, %v2503_v20  ;;  %v691_v43 = vsub.f32 %v636_v13, %v675_v27  ;;  %v960_v44 = vmul.f32 %v2503_v20, %v944_v23  ;;  %v2487_v23 = vld [vmem:[#allocation2 + $0x20] sm:$0xff]  }
 0x12f   : > { %v721_v41 = vadd.f32 1e-05, %v705_v25  ;;  %v3060_v58 = vpop.f32.mrf.mxu0  ;;  %2307 = vmatmul.mubr.msk.f32.vlgmr.msra.gmra.mxu0 %vm746_vm1, %v2501_v14  ;;  %v2505_v46 = vpop.eup %2504  ;;  %2516 = vrsqrt.f32 %v722_v15  ;;  %v948_v20 = vsub.f32 0.0, %v3025_v21  ;;  %v949_v25 = vsub.f32 0.0, %v3021_v12 }
 0x130   : > { %v646_v61 = vpop.f32.mrf.mxu1  ;;  %v724_v48 = vadd.f32 1e-05, %v708_v34  ;;  %v694_v51 = vsub.f32 %v2300_v31, %v678_v36  ;;  %v677_v53 = vmul.f32 %v3060_v58, %v3060_v58  ;;  %2357 = vmatpush3.bf16.msra.mxu0 %v3002_v57  ;;  %v707_v62 = vmax.f32 %v691_v43, 0.0  ;;  %2332 = vmatprep.mubr.msk.f32.mxu1 %vm746_vm1, %v960_v44 }
 0x131   : > { %v2507_v55 = vpop.eup %2506  ;;  %2518 = vrsqrt.f32 %v721_v41  ;;  %v3069_v63 = vpop.f32.mrf.mxu0  ;;  %2358 = vmatprep.subr.bf16.mxu0 %v2485_v33  ;;  %2333 = vmatmul.mubr.msk.f32.vlgmr.msra.gmra.mxu1 %vm746_vm1, %v961_v38  ;;  %v963_v8 = vmul.f32 %v2505_v46, %v947_v56  ;;  %v951_v44 = vsub.f32 0.0, %v3029_v29  ;;  %v953_v29 = vsub.f32 0.0, %v3037_v49 }
 0x132   : > { %v2303_v0 = vpop.f32.mrf.mxu1  ;;  %v710_v3 = vmax.f32 %v694_v51, 0.0  ;;  %v693_v5 = vsub.f32 %v646_v61, %v677_v53  ;;  %v680_v7 = vmul.f32 %v3069_v63, %v3069_v63  ;;  %2309 = vmatprep.mubr.msk.f32.mxu0 %vm746_vm1, %v2507_v55  ;;  %2520 = vrsqrt.f32 %v724_v48  ;;  %v2488_v61 = vld [vmem:[#allocation2 + $0x18] sm:$0xff]  }
 0x133   : > { %v723_v57 = vadd.f32 1e-05, %v707_v62  ;;  %v3075_v1 = vpop.f32.mrf.mxu0  ;;  %2310 = vmatmul.mubr.msk.f32.gmra.mxu0 %vm746_vm1, %v2505_v46  ;;  %v962_v6 = vmul.f32 %v2507_v55, %v946_v59  ;;  %v952_v53 = vsub.f32 0.0, %v3041_v60  ;;  %v955_v60 = vsub.f32 0.0, %v3045_v4 }
 0x134   : > { %v2509_v9 = vpop.eup %2508  ;;  %v726_v10 = vadd.f32 1e-05, %v710_v3  ;;  %v709_v13 = vmax.f32 %v693_v5, 0.0  ;;  %v696_v14 = vsub.f32 %v2303_v0, %v680_v7  ;;  %v679_v15 = vmul.f32 %v3075_v1, %v3075_v1  ;;  %2359 = vmatpush3.bf16.msra.mxu0 %v2485_v33  ;;  %v656_v22 = vpop.f32.mrf.mxu1 }
 0x135   : > { %v2511_v17 = vpop.eup %2510  ;;  %2522 = vrsqrt.f32 %v723_v57  ;;  %2335 = vmatprep.mubr.msk.f32.mxu1 %vm746_vm1, %v962_v6  ;;  %2360 = vmatprep.subr.bf16.mxu0 %v2486_v2  ;;  %v950_v33 = vsub.f32 0.0, %v3033_v39  ;;  %v965_v43 = vmul.f32 %v2509_v9, %v949_v25  ;;  %v954_v0 = vsub.f32 0.0, %v3049_v11 }
 0x136   : > { %v725_v27 = vadd.f32 1e-05, %v709_v13  ;;  %v712_v31 = vmax.f32 %v696_v14, 0.0  ;;  %v695_v34 = vsub.f32 %v656_v22, %v679_v15  ;;  %2336 = vmatmul.mubr.msk.f32.gmra.mxu1 %vm746_vm1, %v963_v8  ;;  %2312 = vmatprep.mubr.msk.f32.mxu0 %vm746_vm1, %v2511_v17  ;;  %2524 = vrsqrt.f32 %v726_v10  ;;  %v2490_v14 = vld [vmem:[#allocation2 + $0x8] sm:$0xff]   ;;  %v2491_v15 = vld [vmem:[#allocation2] sm:$0xff]  }
 0x137   : > { %2313 = vmatmul.mubr.msk.f32.gmra.mxu0 %vm746_vm1, %v2509_v9  ;;  %v964_v21 = vmul.f32 %v2511_v17, %v948_v20  ;;  %v2513_v36 = vpop.eup %2512  ;;  %v956_v5 = vsub.f32 0.0, %v3060_v58  ;;  %v957_v11 = vsub.f32 0.0, %v3055_v28  ;;  %v958_v8 = vsub.f32 0.0, %v3075_v1  ;;  %v2489_v1 = vld [vmem:[#allocation2 + $0x10] sm:$0xff]  }
 0x138   : > { %2526 = vrsqrt.f32 %v725_v27  ;;  %v728_v38 = vadd.f32 1e-05, %v712_v31  ;;  %v711_v41 = vmax.f32 %v695_v34, 0.0  ;;  %2361 = vmatpush3.bf16.msra.mxu0 %v2486_v2  ;;  %v967_v48 = vmul.f32 %v2513_v36, %v951_v44 }
 0x139   : > { %v2515_v12 = vpop.eup %2514  ;;  %2338 = vmatprep.mubr.msk.f32.mxu1 %vm746_vm1, %v964_v21  ;;  %2362 = vmatprep.subr.bf16.mxu0 %v2487_v23  ;;  %v959_v10 = vsub.f32 0.0, %v3069_v63 }
 0x13a   : > { %v727_v46 = vadd.f32 1e-05, %v711_v41  ;;  %2339 = vmatmul.mubr.msk.f32.gmra.mxu1 %vm746_vm1, %v965_v43  ;;  %2315 = vmatprep.mubr.msk.f32.mxu0 %vm746_vm1, %v2515_v12  ;;  %v966_v39 = vmul.f32 %v2515_v12, %v950_v33  ;;  %2528 = vrsqrt.f32 %v728_v38 }
 0x13b   : > { %2316 = vmatmul.mubr.msk.f32.gmra.mxu0 %vm746_vm1, %v2513_v36 }
 0x13c   : > { %2530 = vrsqrt.f32 %v727_v46  ;;  %2341 = vmatprep.mubr.msk.f32.mxu1 %vm746_vm1, %v966_v39  ;;  %2363 = vmatpush3.bf16.msra.mxu0 %v2487_v23  ;;  %v2517_v51 = vpop.eup %2516 }
 0x13d   : > { %2364 = vmatprep.subr.bf16.mxu0 %v2488_v61  ;;  %v969_v62 = vmul.f32 %v2517_v51, %v953_v29 }
 0x13e   : > { %v2519_v55 = vpop.eup %2518  ;;  %2342 = vmatmul.mubr.msk.f32.gmra.mxu1 %vm746_vm1, %v967_v48 }
 0x13f   : > { %2318 = vmatprep.mubr.msk.f32.mxu0 %vm746_vm1, %v2519_v55  ;;  %v968_v56 = vmul.f32 %v2519_v55, %v952_v53  ;;  %v2521_v59 = vpop.eup %2520 }
 0x140   : > { %2319 = vmatmul.mubr.msk.f32.gmra.mxu0 %vm746_vm1, %v2517_v51  ;;  %v971_v7 = vmul.f32 %v2521_v59, %v955_v60 }
 0x141   : > { %2344 = vmatprep.mubr.msk.f32.mxu1 %vm746_vm1, %v968_v56  ;;  %2365 = vmatpush3.bf16.msra.mxu0 %v2488_v61 }
 0x142   : > { %v2523_v2 = vpop.eup %2522  ;;  %2345 = vmatmul.mubr.msk.f32.gmra.mxu1 %vm746_vm1, %v969_v62  ;;  %2366 = vmatprep.subr.bf16.mxu0 %v2489_v1 }
 0x143   : > { %2321 = vmatprep.mubr.msk.f32.mxu0 %vm746_vm1, %v2523_v2  ;;  %v970_v49 = vmul.f32 %v2523_v2, %v954_v0  ;;  %v2525_v3 = vpop.eup %2524 }
 0x144   : > { %2322 = vmatmul.mubr.msk.f32.gmra.mxu0 %vm746_vm1, %v2521_v59  ;;  %v973_v58 = vmul.f32 %v2525_v3, %v957_v11 }
 0x145   : > { %v2527_v57 = vpop.eup %2526  ;;  %2347 = vmatprep.mubr.msk.f32.mxu1 %vm746_vm1, %v970_v49  ;;  %2367 = vmatpush3.bf16.msra.mxu0 %v2489_v1 }
 0x146   : > { %2348 = vmatmul.mubr.msk.f32.gmra.mxu1 %vm746_vm1, %v971_v7  ;;  %2324 = vmatprep.mubr.msk.f32.mxu0 %vm746_vm1, %v2527_v57  ;;  %v972_v4 = vmul.f32 %v2527_v57, %v956_v5 }
 0x147   : > { %v2529_v6 = vpop.eup %2528  ;;  %2368 = vmatprep.subr.bf16.mxu0 %v2490_v14 }
 0x148   : > { %2325 = vmatmul.mubr.msk.f32.gmra.mxu0 %vm746_vm1, %v2525_v3  ;;  %2350 = vmatprep.mubr.msk.f32.mxu1 %vm746_vm1, %v972_v4  ;;  %v975_v13 = vmul.f32 %v2529_v6, %v959_v10 }
 0x149   : > { %v2531_v9 = vpop.eup %2530  ;;  %2369 = vmatpush3.bf16.msra.mxu0 %v2490_v14 }
 0x14a   : > { %2351 = vmatmul.mubr.msk.f32.gmra.mxu1 %vm746_vm1, %v973_v58  ;;  %2327 = vmatprep.mubr.msk.f32.mxu0 %vm746_vm1, %v2531_v9  ;;  %v974_v28 = vmul.f32 %v2531_v9, %v958_v8 }
 0x14b   : > { %2370 = vmatprep.subr.bf16.mxu0 %v2491_v15 }
 0x14c   : > { %2328 = vmatmul.mubr.msk.f32.gmra.mxu0 %vm746_vm1, %v2529_v6  ;;  %2353 = vmatprep.mubr.msk.f32.mxu1 %vm746_vm1, %v974_v28 }
 0x14d   : > { %2371 = vmatpush3.bf16.msra.mxu0 %v2491_v15 }
 0x14e   : > { %2354 = vmatmul.mubr.msk.f32.gmra.mxu1 %vm746_vm1, %v975_v13 }
 0x1ef   : > { %v2308_v63 = vpop.f32.mrf.mxu0 }
 0x1f0   : > { %v1170_v17 = vmul.f32 %v2308_v63, %v2912_v18 }
 0x1f1   : > { %v865_v20 = vpop.f32.mrf.mxu0  ;;  %v2334_v23 = vpop.f32.mrf.mxu1 }
 0x1f2   : > { %v1169_v22 = vmul.f32 %v2907_v16, %v865_v20  ;;  %v1186_v31 = vadd.f32 %v2334_v23, %v1170_v17 }
 0x1f3   : > { %v2311_v25 = vpop.f32.mrf.mxu0  ;;  %v1090_v27 = vpop.f32.mrf.mxu1 }
 0x1f4   : > { %v1172_v34 = vmul.f32 %v2311_v25, %v2924_v24  ;;  %v1185_v33 = vadd.f32 %v1169_v22, %v1090_v27 }
 0x1f5   : > { %v875_v21 = vpop.f32.mrf.mxu0 }
 0x1f6   : > { %v1171_v36 = vmul.f32 %v2914_v19, %v875_v21  ;;  %v2337_v38 = vpop.f32.mrf.mxu1  ;;  %v1201_v41 = vpack.c.bf16 %v1186_v31, %v1185_v33 }
 0x1f7   : > { %v2314_v43 = vpop.f32.mrf.mxu0  ;;  %v1188_v61 = vadd.f32 %v2337_v38, %v1172_v34  ;;  %v2495_v38 = vld [vmem:[#allocation5 + $0x20] sm:$0xff]  }
 0x1f8   : > { %v1100_v12 = vpop.f32.mrf.mxu1  ;;  %v1174_v18 = vmul.f32 %v2314_v43, %v2938_v30  ;;  %2372 = vmatprep.mubr.bf16.mxu0 %v1201_v41  ;;  %v2496_v41 = vld [vmem:[#allocation5 + $0x18] sm:$0xff]   ;;  %v2498_v43 = vld [vmem:[#allocation5 + $0x8] sm:$0xff]  }
 0x1f9   : > { %v1187_v44 = vadd.f32 %v1171_v36, %v1100_v12  ;;  %v885_v16 = vpop.f32.mrf.mxu0  ;;  %v2492_v36 = vld [vmem:[#allocation5 + $0x38] sm:$0xff]   ;;  %v2499_v12 = vld [vmem:[#allocation5] sm:$0xff]  }
 0x1fa   : > { %v1173_v46 = vmul.f32 %v2928_v26, %v885_v16  ;;  %v2340_v39 = vpop.f32.mrf.mxu1  ;;  %2388 = vmatprep.subr.bf16.mxu1 %v2492_v36 }
 0x1fb   : > { %v1202_v48 = vpack.c.bf16 %v1188_v61, %v1187_v44  ;;  %v2317_v51 = vpop.f32.mrf.mxu0  ;;  %v1190_v53 = vadd.f32 %v2340_v39, %v1174_v18  ;;  %2389 = vmatpush3.bf16.msra.mxu1 %v2492_v36  ;;  %v3137_v61 = vld [vmem:[%s3290_s4] ss:$0 sm:$0xff] }
 0x1fc   : > { %v1110_v24 = vpop.f32.mrf.mxu1  ;;  %v1176_v55 = vmul.f32 %v2317_v51, %v2949_v35 }
 0x1fd   : > { %v1189_v19 = vadd.f32 %v1173_v46, %v1110_v24  ;;  %2373 = vmatmul.mubr.bf16.vlgmr.msra.gmra.mxu0 %v1202_v48  ;;  %v895_v29 = vpop.f32.mrf.mxu0 }
 0x1fe   : > { %v1175_v56 = vmul.f32 %v2943_v32, %v895_v29  ;;  %v2343_v59 = vpop.f32.mrf.mxu1 }
 0x1ff   : > { %v1203_v62 = vpack.c.bf16 %v1190_v53, %v1189_v19  ;;  %v1192_v2 = vadd.f32 %v2343_v59, %v1176_v55 }
 0x200   : > { %v2320_v30 = vpop.f32.mrf.mxu0  ;;  %v1120_v0 = vpop.f32.mrf.mxu1 }
 0x201   : > { %v1178_v60 = vmul.f32 %v2320_v30, %v2960_v40  ;;  %v1191_v26 = vadd.f32 %v1175_v56, %v1120_v0  ;;  %2376 = vmatprep.mubr.bf16.mxu0 %v1203_v62 }
 0x202   : > { %v905_v49 = vpop.f32.mrf.mxu0  ;;  %v2346_v3 = vpop.f32.mrf.mxu1 }
 0x203   : > { %v1204_v5 = vpack.c.bf16 %v1192_v2, %v1191_v26  ;;  %v1177_v7 = vmul.f32 %v2954_v37, %v905_v49  ;;  %v1194_v11 = vadd.f32 %v2346_v3, %v1178_v60 }
 0x204   : > { %v2323_v35 = vpop.f32.mrf.mxu0  ;;  %v1130_v57 = vpop.f32.mrf.mxu1 }
 0x205   : > { %v1180_v4 = vmul.f32 %v2323_v35, %v2971_v45  ;;  %v1193_v32 = vadd.f32 %v1177_v7, %v1130_v57  ;;  %2377 = vmatmul.mubr.bf16.gmra.mxu0 %v1204_v5 }
 0x206   : > { %v915_v6 = vpop.f32.mrf.mxu0  ;;  %v2349_v8 = vpop.f32.mrf.mxu1 }
 0x207   : > { %v1205_v58 = vpack.c.bf16 %v1194_v11, %v1193_v32  ;;  %v1179_v9 = vmul.f32 %v2965_v42, %v915_v6  ;;  %v1196_v28 = vadd.f32 %v2349_v8, %v1180_v4 }
 0x208   : > { %v2326_v40 = vpop.f32.mrf.mxu0  ;;  %v1140_v10 = vpop.f32.mrf.mxu1 }
 0x209   : > { %v1182_v13 = vmul.f32 %v2326_v40, %v2982_v50  ;;  %v1195_v1 = vadd.f32 %v1179_v9, %v1140_v10  ;;  %2380 = vmatprep.mubr.bf16.mxu0 %v1205_v58 }
 0x20a   : > { %v925_v37 = vpop.f32.mrf.mxu0  ;;  %v2352_v14 = vpop.f32.mrf.mxu1 }
 0x20b   : > { %v1206_v15 = vpack.c.bf16 %v1196_v28, %v1195_v1  ;;  %v1181_v63 = vmul.f32 %v2976_v47, %v925_v37  ;;  %v1198_v20 = vadd.f32 %v2352_v14, %v1182_v13  ;;  %v2493_v47 = vld [vmem:[#allocation5 + $0x30] sm:$0xff]  }
 0x20c   : > { %v2329_v45 = vpop.f32.mrf.mxu0  ;;  %v1150_v17 = vpop.f32.mrf.mxu1  ;;  %2390 = vmatprep.subr.bf16.mxu1 %v2493_v47 }
 0x20d   : > { %v1184_v22 = vmul.f32 %v2329_v45, %v2992_v54  ;;  %v1197_v23 = vadd.f32 %v1181_v63, %v1150_v17  ;;  %2381 = vmatmul.mubr.bf16.gmra.mxu0 %v1206_v15  ;;  %2391 = vmatpush3.bf16.msra.mxu1 %v2493_v47  ;;  %v2494_v54 = vld [vmem:[#allocation5 + $0x28] sm:$0xff]  }
 0x20e   : > { %v935_v42 = vpop.f32.mrf.mxu0  ;;  %v2355_v25 = vpop.f32.mrf.mxu1  ;;  %2392 = vmatprep.subr.bf16.mxu1 %v2494_v54 }
 0x20f   : > { %v1207_v27 = vpack.c.bf16 %v1198_v20, %v1197_v23  ;;  %v1183_v31 = vmul.f32 %v2987_v52, %v935_v42  ;;  %v1200_v34 = vadd.f32 %v2355_v25, %v1184_v22  ;;  %v2497_v52 = vld [vmem:[#allocation5 + $0x10] sm:$0xff]  }
 0x210   : > { %v1160_v50 = vpop.f32.mrf.mxu1 }
 0x211   : > { %v1199_v33 = vadd.f32 %v1183_v31, %v1160_v50  ;;  %2384 = vmatprep.mubr.bf16.mxu0 %v1207_v27  ;;  %2393 = vmatpush3.bf16.msra.mxu1 %v2494_v54 }
 0x212   : > { %2394 = vmatprep.subr.bf16.mxu1 %v2495_v38 }
 0x213   : > { %v1208_v21 = vpack.c.bf16 %v1200_v34, %v1199_v33 }
 0x215   : > { %2385 = vmatmul.mubr.bf16.gmra.mxu0 %v1208_v21  ;;  %2395 = vmatpush3.bf16.msra.mxu1 %v2495_v38 }
 0x216   : > { %2396 = vmatprep.subr.bf16.mxu1 %v2496_v41 }
 0x219   : > { %2397 = vmatpush3.bf16.msra.mxu1 %v2496_v41 }
 0x21a   : > { %2398 = vmatprep.subr.bf16.mxu1 %v2497_v52 }
 0x21d   : > { %2399 = vmatpush3.bf16.msra.mxu1 %v2497_v52 }
 0x21e   : > { %2400 = vmatprep.subr.bf16.mxu1 %v2498_v43 }
 0x221   : > { %2401 = vmatpush3.bf16.msra.mxu1 %v2498_v43 }
 0x222   : > { %2402 = vmatprep.subr.bf16.mxu1 %v2499_v12 }
 0x225   : > { %2403 = vmatpush3.bf16.msra.mxu1 %v2499_v12 }
 0x2bd   : > { %v2374_v18 = vpop.f32.mrf.mxu0 }
 0x2be   : > { %v3140_v44 = vadd.f32 %v2374_v18, %v3137_v61 }
 0x2bf   : > { %v1314_v16 = vpop.f32.mrf.mxu0 }
 0x2c0   : > { %v1915_v46 = vmul.f32 -1.702, %v3140_v44  ;;  %v3144_v39 = vadd.f32 %v3137_v61, %v1314_v16 }
 0x2c1   : > { %v2375_v48 = vpop.f32.mrf.mxu0 }
 0x2c2   : > { %v1413_v51 = vmul.f32 1.442695, %v1915_v46  ;;  %v1913_v24 = vmul.f32 -1.702, %v3144_v39  ;;  %v3148_v53 = vadd.f32 %v2375_v48, %v3137_v61 }
 0x2c3   : > { %v1317_v55 = vpop.f32.mrf.mxu0 }
 0x2c4   : > { %2532 = vpow2.f32 %v1413_v51  ;;  %v1409_v19 = vmul.f32 1.442695, %v1913_v24  ;;  %v1916_v29 = vmul.f32 -1.702, %v3148_v53  ;;  %v3152_v56 = vadd.f32 %v3137_v61, %v1317_v55 }
 0x2c5   : > { %v2378_v59 = vpop.f32.mrf.mxu0 }
 0x2c6   : > { %2534 = vpow2.f32 %v1409_v19  ;;  %v1415_v62 = vmul.f32 1.442695, %v1916_v29  ;;  %v1914_v30 = vmul.f32 -1.702, %v3152_v56  ;;  %v3156_v0 = vadd.f32 %v2378_v59, %v3137_v61 }
 0x2c7   : > { %v1330_v2 = vpop.f32.mrf.mxu0 }
 0x2c8   : > { %2536 = vpow2.f32 %v1415_v62  ;;  %v1411_v60 = vmul.f32 1.442695, %v1914_v30  ;;  %v1919_v26 = vmul.f32 -1.702, %v3156_v0  ;;  %v3160_v49 = vadd.f32 %v3137_v61, %v1330_v2 }
 0x2c9   : > { %v2379_v3 = vpop.f32.mrf.mxu0 }
 0x2ca   : > { %2538 = vpow2.f32 %v1411_v60  ;;  %v1421_v5 = vmul.f32 1.442695, %v1919_v26  ;;  %v1917_v7 = vmul.f32 -1.702, %v3160_v49  ;;  %v3164_v35 = vadd.f32 %v2379_v3, %v3137_v61 }
 0x2cb   : > { %v1333_v57 = vpop.f32.mrf.mxu0 }
 0x2cc   : > { %2540 = vpow2.f32 %v1421_v5  ;;  %v1417_v11 = vmul.f32 1.442695, %v1917_v7  ;;  %v1920_v4 = vmul.f32 -1.702, %v3164_v35  ;;  %v3168_v32 = vadd.f32 %v3137_v61, %v1333_v57 }
 0x2cd   : > { %v2382_v6 = vpop.f32.mrf.mxu0 }
 0x2ce   : > { %2542 = vpow2.f32 %v1417_v11  ;;  %v1423_v8 = vmul.f32 1.442695, %v1920_v4  ;;  %v1918_v58 = vmul.f32 -1.702, %v3168_v32  ;;  %v3172_v9 = vadd.f32 %v2382_v6, %v3137_v61 }
 0x2cf   : > { %v1346_v40 = vpop.f32.mrf.mxu0 }
 0x2d0   : > { %2544 = vpow2.f32 %v1423_v8  ;;  %v1419_v10 = vmul.f32 1.442695, %v1918_v58  ;;  %v1923_v28 = vmul.f32 -1.702, %v3172_v9  ;;  %v3176_v13 = vadd.f32 %v3137_v61, %v1346_v40 }
 0x2d1   : > { %v2533_v1 = vpop.eup %2532  ;;  %v2383_v37 = vpop.f32.mrf.mxu0 }
 0x2d2   : > { %v1443_v14 = vadd.f32 1.0, %v2533_v1  ;;  %2546 = vpow2.f32 %v1419_v10  ;;  %v1429_v15 = vmul.f32 1.442695, %v1923_v28  ;;  %v1921_v63 = vmul.f32 -1.702, %v3176_v13 }
 0x2d3   : > { %v2535_v45 = vpop.eup %2534  ;;  %v3180_v17 = vadd.f32 %v2383_v37, %v3137_v61  ;;  %v1349_v20 = vpop.f32.mrf.mxu0 }
 0x2d4   : > { %2548 = vrcp.f32 %v1443_v14  ;;  %v1441_v22 = vadd.f32 1.0, %v2535_v45  ;;  %v1425_v23 = vmul.f32 1.442695, %v1921_v63  ;;  %v3183_v42 = vadd.f32 %v3137_v61, %v1349_v20 }
 0x2d5   : > { %v2537_v25 = vpop.eup %2536  ;;  %2550 = vpow2.f32 %v1429_v15  ;;  %v1924_v27 = vmul.f32 -1.702, %v3180_v17  ;;  %v2386_v31 = vpop.f32.mrf.mxu0 }
 0x2d6   : > { %2552 = vrcp.f32 %v1441_v22  ;;  %v1444_v50 = vadd.f32 1.0, %v2537_v25  ;;  %v1922_v34 = vmul.f32 -1.702, %v3183_v42  ;;  %v3188_v33 = vadd.f32 %v2386_v31, %v3137_v61 }
 0x2d7   : > { %v2539_v21 = vpop.eup %2538  ;;  %2554 = vpow2.f32 %v1425_v23  ;;  %v1431_v36 = vmul.f32 1.442695, %v1924_v27  ;;  %v1362_v47 = vpop.f32.mrf.mxu0 }
 0x2d8   : > { %2556 = vrcp.f32 %v1444_v50  ;;  %v1442_v54 = vadd.f32 1.0, %v2539_v21  ;;  %v1427_v38 = vmul.f32 1.442695, %v1922_v34  ;;  %v1927_v41 = vmul.f32 -1.702, %v3188_v33 }
 0x2d9   : > { %v2541_v52 = vpop.eup %2540  ;;  %2558 = vpow2.f32 %v1431_v36  ;;  %v3192_v43 = vadd.f32 %v3137_v61, %v1362_v47  ;;  %v2387_v12 = vpop.f32.mrf.mxu0 }
 0x2da   : > { %2560 = vrcp.f32 %v1442_v54  ;;  %v1447_v18 = vadd.f32 1.0, %v2541_v52  ;;  %v1437_v16 = vmul.f32 1.442695, %v1927_v41  ;;  %v3195_v46 = vadd.f32 %v2387_v12, %v3137_v61 }
 0x2db   : > { %v2543_v48 = vpop.eup %2542  ;;  %2562 = vpow2.f32 %v1427_v38  ;;  %v1925_v51 = vmul.f32 -1.702, %v3192_v43  ;;  %v1365_v24 = vpop.f32.mrf.mxu0 }
 0x2dc   : > { %2564 = vrcp.f32 %v1447_v18  ;;  %v1445_v55 = vadd.f32 1.0, %v2543_v48  ;;  %v1928_v19 = vmul.f32 -1.702, %v3195_v46  ;;  %v3200_v29 = vadd.f32 %v3137_v61, %v1365_v24 }
 0x2dd   : > { %v2545_v59 = vpop.eup %2544  ;;  %2566 = vpow2.f32 %v1437_v16  ;;  %v1433_v62 = vmul.f32 1.442695, %v1925_v51 }
 0x2de   : > { %2568 = vrcp.f32 %v1445_v55  ;;  %v1448_v30 = vadd.f32 1.0, %v2545_v59  ;;  %v1439_v2 = vmul.f32 1.442695, %v1928_v19  ;;  %v1926_v60 = vmul.f32 -1.702, %v3200_v29 }
 0x2df   : > { %v2547_v26 = vpop.eup %2546  ;;  %2570 = vpow2.f32 %v1433_v62 }
 0x2e0   : > { %2572 = vrcp.f32 %v1448_v30  ;;  %v1446_v3 = vadd.f32 1.0, %v2547_v26  ;;  %v1435_v5 = vmul.f32 1.442695, %v1926_v60  ;;  %v1929_v26 = vld [vmem:[%s3292_s6] ss:$0 sm:$0xff] }
 0x2e1   : > { %v2549_v7 = vpop.eup %2548  ;;  %2574 = vpow2.f32 %v1439_v2 }
 0x2e2   : > { %v2551_v57 = vpop.eup %2550  ;;  %2576 = vrcp.f32 %v1446_v3  ;;  %v1491_v63 = vmul.f32 %v2549_v7, %v3140_v44 }
 0x2e3   : > { %v2553_v11 = vpop.eup %2552  ;;  %2578 = vpow2.f32 %v1435_v5  ;;  %v1451_v58 = vadd.f32 1.0, %v2551_v57 }
 0x2e4   : > { %v2555_v61 = vpop.eup %2554  ;;  %v1489_v37 = vmul.f32 %v2553_v11, %v3144_v39 }
 0x2e5   : > { %v2557_v4 = vpop.eup %2556  ;;  %v1449_v6 = vadd.f32 1.0, %v2555_v61 }
 0x2e6   : > { %v2559_v8 = vpop.eup %2558  ;;  %v1492_v10 = vmul.f32 %v2557_v4, %v3148_v53 }
 0x2e7   : > { %v2561_v40 = vpop.eup %2560  ;;  %v1452_v28 = vadd.f32 1.0, %v2559_v8  ;;  %2580 = vrcp.f32 %v1449_v6 }
 0x2e8   : > { %v2563_v1 = vpop.eup %2562  ;;  %v1490_v14 = vmul.f32 %v2561_v40, %v3152_v56  ;;  %v1506_v25 = vpack.c.bf16 %v1492_v10, %v1491_v63 }
 0x2e9   : > { %v2565_v15 = vpop.eup %2564  ;;  %2582 = vrcp.f32 %v1452_v28  ;;  %v1450_v45 = vadd.f32 1.0, %v2563_v1 }
 0x2ea   : > { %v2567_v20 = vpop.eup %2566  ;;  %2584 = vrcp.f32 %v1451_v58  ;;  %v1505_v22 = vpack.c.bf16 %v1490_v14, %v1489_v37  ;;  %v1495_v54 = vmul.f32 %v2565_v15, %v3156_v0 }
 0x2eb   : > { %v2569_v23 = vpop.eup %2568  ;;  %2586 = vrcp.f32 %v1450_v45  ;;  %v1455_v50 = vadd.f32 1.0, %v2567_v20 }
 0x2ec   : > { %v2571_v27 = vpop.eup %2570  ;;  %2404 = vmatprep.mubr.bf16.mxu1 %v1505_v22  ;;  %v1493_v36 = vmul.f32 %v2569_v23, %v3160_v49 }
 0x2ed   : > { %v2573_v53 = vpop.eup %2572  ;;  %v1453_v31 = vadd.f32 1.0, %v2571_v27  ;;  %2405 = vmatmul.mubr.bf16.vlgmr.msra.gmra.mxu1 %v1506_v25 }
 0x2ee   : > { %v2575_v39 = vpop.eup %2574  ;;  %v1496_v34 = vmul.f32 %v2573_v53, %v3164_v35 }
 0x2ef   : > { %v2577_v56 = vpop.eup %2576  ;;  %v1456_v21 = vadd.f32 1.0, %v2575_v39  ;;  %2588 = vrcp.f32 %v1453_v31 }
 0x2f0   : > { %v2579_v44 = vpop.eup %2578  ;;  %v1494_v47 = vmul.f32 %v2577_v56, %v3168_v32  ;;  %v1508_v52 = vpack.c.bf16 %v1496_v34, %v1495_v54 }
 0x2f1   : > { %2590 = vrcp.f32 %v1456_v21  ;;  %v1454_v38 = vadd.f32 1.0, %v2579_v44 }
 0x2f2   : > { %2592 = vrcp.f32 %v1455_v50  ;;  %v1507_v41 = vpack.c.bf16 %v1494_v47, %v1493_v36 }
 0x2f3   : > { %2594 = vrcp.f32 %v1454_v38 }
 0x2f4   : > { %2408 = vmatprep.mubr.bf16.mxu1 %v1507_v41  ;;  %v2581_v12 = vpop.eup %2580 }
 0x2f5   : > { %2409 = vmatmul.mubr.bf16.gmra.mxu1 %v1508_v52  ;;  %v1497_v49 = vmul.f32 %v2581_v12, %v3176_v13 }
 0x2f6   : > { %v2583_v18 = vpop.eup %2582 }
 0x2f7   : > { %v2585_v35 = vpop.eup %2584  ;;  %v1500_v48 = vmul.f32 %v2583_v18, %v3180_v17 }
 0x2f8   : > { %v2587_v16 = vpop.eup %2586  ;;  %v1499_v0 = vmul.f32 %v2585_v35, %v3172_v9 }
 0x2f9   : > { %v1498_v32 = vmul.f32 %v2587_v16, %v3183_v42 }
 0x2fa   : > { %v1510_v24 = vpack.c.bf16 %v1500_v48, %v1499_v0 }
 0x2fb   : > { %v1509_v51 = vpack.c.bf16 %v1498_v32, %v1497_v49 }
 0x2fc   : > { %v2589_v55 = vpop.eup %2588 }
 0x2fd   : > { %2412 = vmatprep.mubr.bf16.mxu1 %v1509_v51  ;;  %v1501_v17 = vmul.f32 %v2589_v55, %v3192_v43 }
 0x2fe   : > { %v2591_v19 = vpop.eup %2590  ;;  %2413 = vmatmul.mubr.bf16.gmra.mxu1 %v1510_v24 }
 0x2ff   : > { %v2593_v59 = vpop.eup %2592  ;;  %v1504_v30 = vmul.f32 %v2591_v19, %v3195_v46 }
 0x300   : > { %v2595_v62 = vpop.eup %2594  ;;  %v1503_v42 = vmul.f32 %v2593_v59, %v3188_v33 }
 0x301   : > { %v1502_v13 = vmul.f32 %v2595_v62, %v3200_v29 }
 0x302   : > { %v1512_v9 = vpack.c.bf16 %v1504_v30, %v1503_v42 }
 0x303   : > { %v1511_v2 = vpack.c.bf16 %v1502_v13, %v1501_v17 }
 0x305   : > { %2416 = vmatprep.mubr.bf16.mxu1 %v1511_v2 }
 0x306   : > { %2417 = vmatmul.mubr.bf16.gmra.mxu1 %v1512_v9 }
 0x3ad   : > { %v2406_v60 = vpop.f32.mrf.mxu1 }
 0x3ae   : > { %v1627_v5 = vadd.f32 %v2406_v60, %v1929_v26 }
 0x3af   : > { %v1618_v3 = vpop.f32.mrf.mxu1 }
 0x3b0   : > { %v1619_v29 = vadd.f32 %v1929_v26, %v1618_v3 }
 0x3b1   : > { %v2407_v46 = vpop.f32.mrf.mxu1 }
 0x3b2   : > { %v1630_v43 = vadd.f32 %v2407_v46, %v1929_v26 }
 0x3b3   : > { %v1621_v7 = vpop.f32.mrf.mxu1 }
 0x3b4   : > { %v2016_v57 = vpack.c.bf16 %v1630_v43, %v1627_v5  ;;  %v1622_v33 = vadd.f32 %v1929_v26, %v1621_v7 }
 0x3b5   : > { %v2410_v11 = vpop.f32.mrf.mxu1 }
 0x3b6   : > { %2055 = vst [vmem:[%s3225_s16 + $0x8] sm:$0xff] %v2016_v57   ;;  %v2011_v61 = vpack.c.bf16 %v1622_v33, %v1619_v29  ;;  %v1643_v8 = vadd.f32 %v2410_v11, %v1929_v26 }
 0x3b7   : > { %v1634_v4 = vpop.f32.mrf.mxu1 }
 0x3b8   : > { %2012 = vst [vmem:[%s3225_s16] sm:$0xff] %v2011_v61   ;;  %v1635_v10 = vadd.f32 %v1929_v26, %v1634_v4 }
 0x3b9   : > { %v2411_v6 = vpop.f32.mrf.mxu1 }
 0x3ba   : > { %v1646_v58 = vadd.f32 %v2411_v6, %v1929_v26 }
 0x3bb   : > { %v1637_v40 = vpop.f32.mrf.mxu1 }
 0x3bc   : > { %v2026_v28 = vpack.c.bf16 %v1646_v58, %v1643_v8  ;;  %v1638_v1 = vadd.f32 %v1929_v26, %v1637_v40 }
 0x3be   : > { %2057 = vst [vmem:[%s3225_s16 + $0x18] sm:$0xff] %v2026_v28   ;;  %v2021_v37 = vpack.c.bf16 %v1638_v1, %v1635_v10  ;;  %v2414_v14 = vpop.f32.mrf.mxu1 }
 0x3bf   : > { %v1659_v45 = vadd.f32 %v2414_v14, %v1929_v26 }
 0x3c0   : > { %2056 = vst [vmem:[%s3225_s16 + $0x10] sm:$0xff] %v2021_v37   ;;  %v1650_v15 = vpop.f32.mrf.mxu1 }
 0x3c1   : > { %v1651_v23 = vadd.f32 %v1929_v26, %v1650_v15 }
 0x3c2   : > { %v2415_v63 = vpop.f32.mrf.mxu1 }
 0x3c3   : > { %v1662_v20 = vadd.f32 %v2415_v63, %v1929_v26 }
 0x3c4   : > { %v1653_v22 = vpop.f32.mrf.mxu1 }
 0x3c5   : > { %v2036_v25 = vpack.c.bf16 %v1662_v20, %v1659_v45  ;;  %v1654_v27 = vadd.f32 %v1929_v26, %v1653_v22 }
 0x3c6   : > { %v2418_v53 = vpop.f32.mrf.mxu1 }
 0x3c7   : > { %2059 = vst [vmem:[%s3225_s16 + $0x28] sm:$0xff] %v2036_v25   ;;  %v2031_v31 = vpack.c.bf16 %v1654_v27, %v1651_v23  ;;  %v1675_v56 = vadd.f32 %v2418_v53, %v1929_v26 }
 0x3c8   : > { %v1666_v39 = vpop.f32.mrf.mxu1 }
 0x3c9   : > { %2058 = vst [vmem:[%s3225_s16 + $0x20] sm:$0xff] %v2031_v31   ;;  %v1667_v44 = vadd.f32 %v1929_v26, %v1666_v39 }
 0x3ca   : > { %v2419_v50 = vpop.f32.mrf.mxu1 }
 0x3cb   : > { %v1678_v34 = vadd.f32 %v2419_v50, %v1929_v26 }
 0x3cc   : > { %v1669_v21 = vpop.f32.mrf.mxu1 }
 0x3cd   : > { %v2046_v36 = vpack.c.bf16 %v1678_v34, %v1675_v56  ;;  %v1670_v47 = vadd.f32 %v1929_v26, %v1669_v21 }
 0x3cf   : > { %2061 = vst [vmem:[%s3225_s16 + $0x38] sm:$0xff] %v2046_v36   ;;  %v2041_v54 = vpack.c.bf16 %v1670_v47, %v1667_v44 }
 0x3d1   : > { %2060 = vst [vmem:[%s3225_s16 + $0x30] sm:$0xff] %v2041_v54  }
 0x3d2   : > { %2661 = shalt.err (!%p2658_p3)
}
 0x3d3   : > { %s2662_s9 = scalar_lea.hbm %s3240_s21, 1024  ;;  %s2666_s17 = scalar_lea.hbm %s3293_s7, 2048 }
 0x3d4   : > { %p2663_p2 = scmp.ne.s32.totalorder %s3240_s21, %s2662_s9  ;;  %p2667_p7 = scmp.lt.s32.totalorder %s3240_s21, %s3293_s7 }
 0x3d5   : > { %p2668_p6 = scmp.lt.s32.totalorder %s2666_s17, %s2662_s9 }
 0x3d6   : > { %p2664_p4 = pnand %p2663_p2, %p2803_p5 }
 0x3d7   : > { %p2669_p9 = por %p2668_p6, %p2667_p7 }
 0x3d8   : > { %p2665_p13 = pneg %p2664_p4 }
 0x3da   : > { %p2670_p10 = pnand %p2669_p9, %p2665_p13 }
 0x3dc   : > { %2673 = shalt.err (!%p2670_p10)
}
 0x3dd   : > { %s2723_s14 = smov 64   ;;  %s2724_s20 = smov 4  }
 0x3de   : > { %2428 = dma.vmem_to_hbm [thread:$0]  (%p2803_p5), %s3235_s18, 1024, %s3240_s21, %s3246_s22, %s2723_s14, %s2723_s14, %s2724_s20  }
 0x3df PF: > { %p2445_p12 = scmp.ge.s32.totalorder %s2716_s27, 2  ;;  %s1790_s28 = sand.u32 1, %s2704_s24  }
 0x3e0   : > { %p3303_p8 = scmp.ne.s32.totalorder %s3296_s12, 0  ;;  %s1791_s23 = scalar_lea.sflag [#allocation4], %s1790_s28 }
 0x3e2   : > { %p2438_p11 = pnand %p2445_p12, %p3303_p8 }
 0x3e4   : > { %p2439_p0 = pneg %p2438_p11 }
 0x3e6   : > { %2699 = dma.done.wait (%p2439_p0), %s1791_s23, 1024  }
 0x3e7   : > { %2701 = vsyncadd (%p2439_p0), %s1791_s23, 4294966272  ;;  %p19_p1 = scmp.ge.s32.totalorder %s2790_s30, 4   ;;  %s3304_s24 = smov %s2708_s25 }
 0x3e8   : > { %s3305_s25 = smov %s2712_s26  ;;  %s3306_s26 = smov %s2801_s10 }
 0x3e9   : > { %s3307_s27 = smov %s2790_s30  ;;  %21 = sbr.rel (!%p19_p1) target bundleno = 5 (0x5), region = 92 }
 0x3ee   :  { %1796 = vsyncpa [#allocation3], 1 }
 0x3ef   :  { %1798 = vsyncpa [#allocation3 + $0x1], 1 }
 0x3f0   :  { %1799 = vsyncpa [#allocation6], 1 }
 0x3f1   :  { %1800 = vsyncpa [#allocation4], 1 }
 0x3f2   :  { %1802 = vsyncpa [#allocation4 + $0x1], 1 }

</bundles_post_ra>
